<compile_context>
chip_gen: v6e
topology: v6e:2x2x1
jax: 0.10.0
libtpu: 0.0.40
codegen_flags: <defaults>
</compile_context>

<pallas_src>
import jax
import jax.numpy as jnp
from jax.experimental import pallas as pl
from jax.experimental.pallas import tpu as pltpu

# Make the pure-JAX reference and the in-kernel matmuls use the same exact-f32 numerics.
jax.config.update("jax_default_matmul_precision", "highest")

BATCH = 2
SEQ = 8
OUTER_DIM = 16          # fc1 input dim (outer_dim in the module)
EMBED = 32              # embed_dim == ffn_dim
NUM_HEADS = 4
HEAD_DIM = EMBED // NUM_HEADS
SCALING = HEAD_DIM ** -0.5
LN_EPS = 1e-5
_INV_SQRT2 = 0.7071067811865476

VEC_ROWS = 8                                             # sublane-padded bias/LN slab rows
_B_FC1, _B_QKV, _B_OUT, _B_FC2, _LN_G, _LN_B = range(6)  # row indices in the bias/LN slab


def _gelu(x):
    """Exact (erf-based) GELU, matching torch.nn.functional.gelu / ACT2FN['gelu']."""
    return 0.5 * x * (1.0 + jax.lax.erf(x * _INV_SQRT2))


def _layer_kernel(x_ref, mask_ref, w_ref, vec_ref, out_ref):
    # Per grid step (one batch element):
    #   x_ref   : (1, S, E)   fc1 input, zero-padded from OUTER_DIM to E lanes
    #   mask_ref: (1, S, S)   additive attention mask
    #   w_ref   : (E, 6E)     [w_fc1_pad | w_qkv (q pre-scaled) | w_out (head-mask folded) | w_fc2]
    #   vec_ref : (8, 3E)     rows: b_fc1, b_qkv, b_out, b_fc2, ln_g, ln_b, 0, 0
    #   out_ref : (1, S, E)
    x = x_ref[0]                                          # (S, E)
    W = w_ref[...]                                        # (E, 6E)
    vec = vec_ref[...]                                    # (8, 3E)

    w_fc1 = W[:, 0:EMBED]
    w_qkv = W[:, EMBED:4 * EMBED]
    w_out = W[:, 4 * EMBED:5 * EMBED]
    w_fc2 = W[:, 5 * EMBED:6 * EMBED]

    b_fc1 = vec[_B_FC1:_B_FC1 + 1, 0:EMBED]
    b_qkv = vec[_B_QKV:_B_QKV + 1, :]
    b_out = vec[_B_OUT:_B_OUT + 1, 0:EMBED]
    b_fc2 = vec[_B_FC2:_B_FC2 + 1, 0:EMBED]
    ln_g = vec[_LN_G:_LN_G + 1, 0:EMBED]
    ln_b = vec[_LN_B:_LN_B + 1, 0:EMBED]

    # fc1 + GELU -> residual stream.
    h = _gelu(jnp.dot(x, w_fc1, preferred_element_type=jnp.float32) + b_fc1)      # (S, E)

    # Packed q/k/v projection: one (S, E) @ (E, 3E) matmul; SCALING already folded into q cols.
    qkv = jnp.dot(h, w_qkv, preferred_element_type=jnp.float32) + b_qkv           # (S, 3E)
    q = qkv[:, 0:EMBED]
    k = qkv[:, EMBED:2 * EMBED]
    v = qkv[:, 2 * EMBED:3 * EMBED]
    kT = k.T                                   # one transpose per batch; per-head sublane slices
    mask = mask_ref[0]                         # (S, S)

    # Per-head attention; contexts lane-concatenated (no VMEM scratch, no masked stores).
    ctx_heads = []
    for hd in range(NUM_HEADS):
        c0 = hd * HEAD_DIM
        s = jnp.dot(q[:, c0:c0 + HEAD_DIM], kT[c0:c0 + HEAD_DIM, :],
                    preferred_element_type=jnp.float32) + mask                    # (S, S)
        s = s - jnp.max(s, axis=-1, keepdims=True)
        p = jnp.exp(s)
        p = p / jnp.sum(p, axis=-1, keepdims=True)     # exact divide: EUP is otherwise idle
        # layer_head_mask is folded into w_out rows -> no post-softmax multiply here.
        ctx_heads.append(jnp.dot(p, v[:, c0:c0 + HEAD_DIM],
                                 preferred_element_type=jnp.float32))             # (S, Hd)
    ctx = jnp.concatenate(ctx_heads, axis=-1)                                     # (S, E)

    # Output projection + residual 1.
    attn = jnp.dot(ctx, w_out, preferred_element_type=jnp.float32) + b_out
    h = h + attn

    # fc2 + GELU + residual 2.
    h = h + _gelu(jnp.dot(h, w_fc2, preferred_element_type=jnp.float32) + b_fc2)

    # Final LayerNorm (eps = 1e-5, affine).
    mu = jnp.mean(h, axis=-1, keepdims=True)
    xc = h - mu
    var = jnp.mean(xc * xc, axis=-1, keepdims=True)
    out_ref[0] = xc * jax.lax.rsqrt(var + LN_EPS) * ln_g + ln_b


def extend_encoder_layer_forward(hidden_pos_states, attention_mask, layer_head_mask, params):
    """hidden_pos_states: (B, S, OUTER) f32; attention_mask: (B, 1, S, S) additive;
    layer_head_mask: (H,). Returns (B, S, E)."""
    bsz, seq, outer = hidden_pos_states.shape
    assert (bsz, seq, outer) == (BATCH, SEQ, OUTER_DIM)
    assert attention_mask.shape == (bsz, 1, seq, seq)
    assert outer <= EMBED

    # --- one-time, weight-load-time constant folding + packing (cuts ~13 DMAs to 4) ---
    w_fc1_pad = jnp.zeros((EMBED, EMBED), jnp.float32).at[:outer, :].set(params["w_fc1"])
    w_qkv = jnp.concatenate(
        [params["wq"] * SCALING, params["wk"], params["wv"]], axis=1)             # (E, 3E)
    head_scale = jnp.repeat(layer_head_mask, HEAD_DIM)                            # (E,)
    w_out = params["wo"] * head_scale[:, None]        # (p*m)@v@Wo == (p@v)@(m-scaled Wo)
    w_slab = jnp.concatenate([w_fc1_pad, w_qkv, w_out, params["w_fc2"]], axis=1)  # (E, 6E)

    def _row(vv):
        return jnp.pad(vv, (0, 3 * EMBED - vv.shape[0]))

    b_qkv = jnp.concatenate([params["bq"] * SCALING, params["bk"], params["bv"]])  # (3E,)
    vec_slab = jnp.stack([
        _row(params["b_fc1"]), b_qkv, _row(params["bo"]), _row(params["b_fc2"]),
        _row(params["ln_g"]), _row(params["ln_b"]),
        jnp.zeros((3 * EMBED,), jnp.float32), jnp.zeros((3 * EMBED,), jnp.float32),
    ])                                                                             # (8, 3E)

    x_pad = jnp.pad(hidden_pos_states, ((0, 0), (0, 0), (0, EMBED - outer)))       # (B, S, E)
    mask = attention_mask.reshape(bsz, seq, seq)       # drop the size-1 head dim

    out = pl.pallas_call(
        _layer_kernel,
        out_shape=jax.ShapeDtypeStruct((bsz, seq, EMBED), jnp.float32),
        grid=(bsz,),
        in_specs=[
            pl.BlockSpec((1, SEQ, EMBED), lambda b: (b, 0, 0)),
            pl.BlockSpec((1, SEQ, SEQ), lambda b: (b, 0, 0)),
            pl.BlockSpec((EMBED, 6 * EMBED), lambda b: (0, 0)),      # weights stay resident
            pl.BlockSpec((VEC_ROWS, 3 * EMBED), lambda b: (0, 0)),   # biases/LN stay resident
        ],
        out_specs=pl.BlockSpec((1, SEQ, EMBED), lambda b: (b, 0, 0)),
        compiler_params=pltpu.CompilerParams(dimension_semantics=("parallel",)),
    )(x_pad, mask, w_slab, vec_slab)
    return out


def _reference(x, attention_mask, layer_head_mask, params):
    """Pure-JAX replica of ExtendEncoderLayer.forward (eval mode, use_plugin=True)."""
    h = _gelu(x @ params["w_fc1"] + params["b_fc1"])          # (B, S, E)
    residual = h

    bsz, tgt, _ = h.shape
    q = (h @ params["wq"] + params["bq"]) * SCALING
    k = h @ params["wk"] + params["bk"]
    v = h @ params["wv"] + params["bv"]

    def split(t):
        return t.reshape(bsz, tgt, NUM_HEADS, HEAD_DIM).transpose(0, 2, 1, 3)

    qh, kh, vh = split(q), split(k), split(v)
    s = jnp.einsum("bhqd,bhkd->bhqk", qh, kh) + attention_mask
    p = jax.nn.softmax(s, axis=-1)
    p = p * layer_head_mask[None, :, None, None]              # post-softmax head mask
    o = jnp.einsum("bhqk,bhkd->bhqd", p, vh)
    o = o.transpose(0, 2, 1, 3).reshape(bsz, tgt, EMBED)
    attn = o @ params["wo"] + params["bo"]

    h = residual + attn
    residual = h
    h2 = _gelu(h @ params["w_fc2"] + params["b_fc2"])
    h = residual + h2

    mu = h.mean(axis=-1, keepdims=True)
    var = ((h - mu) ** 2).mean(axis=-1, keepdims=True)
    return (h - mu) / jnp.sqrt(var + LN_EPS) * params["ln_g"] + params["ln_b"]


def _init_params(key):
    """nn.Linear stores weights as (out, in); here they are kept pre-transposed to (in, out)."""
    ks = jax.random.split(key, 8)
    std = 0.2

    def lin(k, i, o):
        kw, kb = jax.random.split(k)
        return (std * jax.random.normal(kw, (i, o), jnp.float32),
                std * jax.random.normal(kb, (o,), jnp.float32))

    w_fc1, b_fc1 = lin(ks[0], OUTER_DIM, EMBED)
    wq, bq = lin(ks[1], EMBED, EMBED)
    wk, bk = lin(ks[2], EMBED, EMBED)
    wv, bv = lin(ks[3], EMBED, EMBED)
    wo, bo = lin(ks[4], EMBED, EMBED)
    w_fc2, b_fc2 = lin(ks[5], EMBED, EMBED)
    ln_g = 1.0 + 0.1 * jax.random.normal(ks[6], (EMBED,), jnp.float32)
    ln_b = 0.1 * jax.random.normal(ks[7], (EMBED,), jnp.float32)
    return dict(w_fc1=w_fc1, b_fc1=b_fc1, wq=wq, bq=bq, wk=wk, bk=bk, wv=wv, bv=bv,
                wo=wo, bo=bo, w_fc2=w_fc2, b_fc2=b_fc2, ln_g=ln_g, ln_b=ln_b)


if __name__ == "__main__":
    root = jax.random.PRNGKey(0)
    k_x, k_p, k_m = jax.random.split(root, 3)

    params = _init_params(k_p)
    hidden_pos_states = jax.random.normal(k_x, (BATCH, SEQ, OUTER_DIM), jnp.float32)

    # additive key-padding mask: 0 for attend, large negative for padded keys
    pad = jax.random.bernoulli(k_m, 0.2, (BATCH, SEQ))
    attention_mask = jnp.where(pad, -1e9, 0.0).astype(jnp.float32)
    attention_mask = jnp.broadcast_to(
        attention_mask[:, None, None, :], (BATCH, 1, SEQ, SEQ))

    layer_head_mask = jnp.array([1.0, 0.5, 1.0, 0.0], dtype=jnp.float32)   # (H,)

    out = extend_encoder_layer_forward(hidden_pos_states, attention_mask,
                                       layer_head_mask, params)
    out = jax.block_until_ready(out)

    ref = _reference(hidden_pos_states, attention_mask, layer_head_mask, params)
    assert out.shape == (BATCH, SEQ, EMBED)
    max_err = float(jnp.max(jnp.abs(out - ref)))
    # exact softmax divide + matched f32 matmul precision -> tight tolerance
    assert jnp.allclose(out, ref, atol=1e-4, rtol=1e-4), f"mismatch vs reference: {max_err}"

    print("KERNEL_OK")
</pallas_src>

<mosaic_0001>
module attributes {stable_mosaic.version = 11 : i64} {
  func.func @_layer_kernel(%arg0: i32, %arg1: memref<1x8x32xf32, #tpu.memory_space<vmem>>, %arg2: memref<1x8x8xf32, #tpu.memory_space<vmem>>, %arg3: memref<32x192xf32, #tpu.memory_space<vmem>>, %arg4: memref<8x96xf32, #tpu.memory_space<vmem>>, %arg5: memref<1x8x32xf32, #tpu.memory_space<vmem>>) attributes {dimension_semantics = [#tpu.dimension_semantics<parallel>], iteration_bounds = array<i64: 2>, scalar_prefetch = 0 : i64, scratch_operands = 0 : i64, tpu.core_type = #tpu.core_type<tc>, window_params = [{transform_indices = @transform_0, window_bounds = array<i64: 1, 8, 32>}, {transform_indices = @transform_1, window_bounds = array<i64: 1, 8, 8>}, {pipeline_mode = #tpu.pipeline_mode<synchronous>, transform_indices = @transform_2, window_bounds = array<i64: 32, 192>}, {pipeline_mode = #tpu.pipeline_mode<synchronous>, transform_indices = @transform_3, window_bounds = array<i64: 8, 96>}, {transform_indices = @transform_4, window_bounds = array<i64: 1, 8, 32>}]} {
    %c0 = arith.constant 0 : index
    %c0_0 = arith.constant 0 : index
    %c0_1 = arith.constant 0 : index
    %0 = vector.load %arg1[%c0, %c0_0, %c0_1] : memref<1x8x32xf32, #tpu.memory_space<vmem>>, vector<1x8x32xf32>
    %1 = vector.shape_cast %0 : vector<1x8x32xf32> to vector<8x32xf32>
    %c0_2 = arith.constant 0 : index
    %c0_3 = arith.constant 0 : index
    %2 = vector.load %arg3[%c0_2, %c0_3] : memref<32x192xf32, #tpu.memory_space<vmem>>, vector<32x192xf32>
    %c0_4 = arith.constant 0 : index
    %c0_5 = arith.constant 0 : index
    %3 = vector.load %arg4[%c0_4, %c0_5] : memref<8x96xf32, #tpu.memory_space<vmem>>, vector<8x96xf32>
    %4 = vector.extract_strided_slice %2 {offsets = [0, 0], sizes = [32, 32], strides = [1, 1]} : vector<32x192xf32> to vector<32x32xf32>
    %5 = vector.extract_strided_slice %2 {offsets = [0, 32], sizes = [32, 96], strides = [1, 1]} : vector<32x192xf32> to vector<32x96xf32>
    %6 = vector.extract_strided_slice %2 {offsets = [0, 128], sizes = [32, 32], strides = [1, 1]} : vector<32x192xf32> to vector<32x32xf32>
    %7 = vector.extract_strided_slice %2 {offsets = [0, 160], sizes = [32, 32], strides = [1, 1]} : vector<32x192xf32> to vector<32x32xf32>
    %8 = vector.extract_strided_slice %3 {offsets = [0, 0], sizes = [1, 32], strides = [1, 1]} : vector<8x96xf32> to vector<1x32xf32>
    %9 = vector.extract_strided_slice %3 {offsets = [1, 0], sizes = [1, 96], strides = [1, 1]} : vector<8x96xf32> to vector<1x96xf32>
    %10 = vector.extract_strided_slice %3 {offsets = [2, 0], sizes = [1, 32], strides = [1, 1]} : vector<8x96xf32> to vector<1x32xf32>
    %11 = vector.extract_strided_slice %3 {offsets = [3, 0], sizes = [1, 32], strides = [1, 1]} : vector<8x96xf32> to vector<1x32xf32>
    %12 = vector.extract_strided_slice %3 {offsets = [4, 0], sizes = [1, 32], strides = [1, 1]} : vector<8x96xf32> to vector<1x32xf32>
    %13 = vector.extract_strided_slice %3 {offsets = [5, 0], sizes = [1, 32], strides = [1, 1]} : vector<8x96xf32> to vector<1x32xf32>
    %cst = arith.constant dense<0.000000e+00> : vector<8x32xf32>
    %14 = tpu.matmul %1, %4, %cst {dimension_numbers = #tpu.dot_dimension_numbers<[1], [0], [0], [1], [0, 0, 1, 1], [], []>, precision = #tpu.contract_precision<fp32>} : vector<8x32xf32>, vector<32x32xf32>, vector<8x32xf32> -> vector<8x32xf32>
    %15 = vector.broadcast %8 : vector<1x32xf32> to vector<8x32xf32>
    %16 = arith.addf %14, %15 : vector<8x32xf32>
    %cst_6 = arith.constant 5.000000e-01 : f32
    %17 = vector.broadcast %cst_6 : f32 to vector<8x32xf32>
    %18 = arith.mulf %17, %16 : vector<8x32xf32>
    %cst_7 = arith.constant 0.707106769 : f32
    %19 = vector.broadcast %cst_7 : f32 to vector<8x32xf32>
    %20 = arith.mulf %16, %19 : vector<8x32xf32>
    %21 = math.erf %20 : vector<8x32xf32>
    %cst_8 = arith.constant 1.000000e+00 : f32
    %22 = vector.broadcast %cst_8 : f32 to vector<8x32xf32>
    %23 = arith.addf %22, %21 : vector<8x32xf32>
    %24 = arith.mulf %18, %23 : vector<8x32xf32>
    %cst_9 = arith.constant dense<0.000000e+00> : vector<8x96xf32>
    %25 = tpu.matmul %24, %5, %cst_9 {dimension_numbers = #tpu.dot_dimension_numbers<[1], [0], [0], [1], [0, 0, 1, 1], [], []>, precision = #tpu.contract_precision<fp32>} : vector<8x32xf32>, vector<32x96xf32>, vector<8x96xf32> -> vector<8x96xf32>
    %26 = vector.broadcast %9 : vector<1x96xf32> to vector<8x96xf32>
    %27 = arith.addf %25, %26 : vector<8x96xf32>
    %28 = vector.extract_strided_slice %27 {offsets = [0, 0], sizes = [8, 32], strides = [1, 1]} : vector<8x96xf32> to vector<8x32xf32>
    %29 = vector.extract_strided_slice %27 {offsets = [0, 32], sizes = [8, 32], strides = [1, 1]} : vector<8x96xf32> to vector<8x32xf32>
    %30 = vector.extract_strided_slice %27 {offsets = [0, 64], sizes = [8, 32], strides = [1, 1]} : vector<8x96xf32> to vector<8x32xf32>
    %31 = tpu.transpose %29, [1, 0] : vector<8x32xf32> -> vector<32x8xf32>
    %c0_10 = arith.constant 0 : index
    %c0_11 = arith.constant 0 : index
    %c0_12 = arith.constant 0 : index
    %32 = vector.load %arg2[%c0_10, %c0_11, %c0_12] : memref<1x8x8xf32, #tpu.memory_space<vmem>>, vector<1x8x8xf32>
    %33 = vector.shape_cast %32 : vector<1x8x8xf32> to vector<8x8xf32>
    %34 = vector.extract_strided_slice %28 {offsets = [0, 0], sizes = [8, 8], strides = [1, 1]} : vector<8x32xf32> to vector<8x8xf32>
    %35 = vector.extract_strided_slice %31 {offsets = [0, 0], sizes = [8, 8], strides = [1, 1]} : vector<32x8xf32> to vector<8x8xf32>
    %cst_13 = arith.constant dense<0.000000e+00> : vector<8x8xf32>
    %36 = tpu.matmul %34, %35, %cst_13 {dimension_numbers = #tpu.dot_dimension_numbers<[1], [0], [0], [1], [0, 0, 1, 1], [], []>, precision = #tpu.contract_precision<fp32>} : vector<8x8xf32>, vector<8x8xf32>, vector<8x8xf32> -> vector<8x8xf32>
    %37 = arith.addf %36, %33 : vector<8x8xf32>
    %cst_14 = arith.constant dense<0xFF800000> : vector<8xf32>
    %38 = vector.multi_reduction <maximumf>, %37, %cst_14 [1] : vector<8x8xf32> to vector<8xf32>
    %39 = vector.shape_cast %38 : vector<8xf32> to vector<8x1xf32>
    %40 = vector.broadcast %39 : vector<8x1xf32> to vector<8x8xf32>
    %41 = arith.subf %37, %40 : vector<8x8xf32>
    %42 = math.exp %41 : vector<8x8xf32>
    %cst_15 = arith.constant dense<0.000000e+00> : vector<8xf32>
    %43 = vector.multi_reduction <add>, %42, %cst_15 [1] : vector<8x8xf32> to vector<8xf32>
    %44 = vector.shape_cast %43 : vector<8xf32> to vector<8x1xf32>
    %45 = vector.broadcast %44 : vector<8x1xf32> to vector<8x8xf32>
    %46 = arith.divf %42, %45 : vector<8x8xf32>
    %47 = vector.extract_strided_slice %30 {offsets = [0, 0], sizes = [8, 8], strides = [1, 1]} : vector<8x32xf32> to vector<8x8xf32>
    %cst_16 = arith.constant dense<0.000000e+00> : vector<8x8xf32>
    %48 = tpu.matmul %46, %47, %cst_16 {dimension_numbers = #tpu.dot_dimension_numbers<[1], [0], [0], [1], [0, 0, 1, 1], [], []>, precision = #tpu.contract_precision<fp32>} : vector<8x8xf32>, vector<8x8xf32>, vector<8x8xf32> -> vector<8x8xf32>
    %49 = vector.extract_strided_slice %28 {offsets = [0, 8], sizes = [8, 8], strides = [1, 1]} : vector<8x32xf32> to vector<8x8xf32>
    %50 = vector.extract_strided_slice %31 {offsets = [8, 0], sizes = [8, 8], strides = [1, 1]} : vector<32x8xf32> to vector<8x8xf32>
    %cst_17 = arith.constant dense<0.000000e+00> : vector<8x8xf32>
    %51 = tpu.matmul %49, %50, %cst_17 {dimension_numbers = #tpu.dot_dimension_numbers<[1], [0], [0], [1], [0, 0, 1, 1], [], []>, precision = #tpu.contract_precision<fp32>} : vector<8x8xf32>, vector<8x8xf32>, vector<8x8xf32> -> vector<8x8xf32>
    %52 = arith.addf %51, %33 : vector<8x8xf32>
    %cst_18 = arith.constant dense<0xFF800000> : vector<8xf32>
    %53 = vector.multi_reduction <maximumf>, %52, %cst_18 [1] : vector<8x8xf32> to vector<8xf32>
    %54 = vector.shape_cast %53 : vector<8xf32> to vector<8x1xf32>
    %55 = vector.broadcast %54 : vector<8x1xf32> to vector<8x8xf32>
    %56 = arith.subf %52, %55 : vector<8x8xf32>
    %57 = math.exp %56 : vector<8x8xf32>
    %cst_19 = arith.constant dense<0.000000e+00> : vector<8xf32>
    %58 = vector.multi_reduction <add>, %57, %cst_19 [1] : vector<8x8xf32> to vector<8xf32>
    %59 = vector.shape_cast %58 : vector<8xf32> to vector<8x1xf32>
    %60 = vector.broadcast %59 : vector<8x1xf32> to vector<8x8xf32>
    %61 = arith.divf %57, %60 : vector<8x8xf32>
    %62 = vector.extract_strided_slice %30 {offsets = [0, 8], sizes = [8, 8], strides = [1, 1]} : vector<8x32xf32> to vector<8x8xf32>
    %cst_20 = arith.constant dense<0.000000e+00> : vector<8x8xf32>
    %63 = tpu.matmul %61, %62, %cst_20 {dimension_numbers = #tpu.dot_dimension_numbers<[1], [0], [0], [1], [0, 0, 1, 1], [], []>, precision = #tpu.contract_precision<fp32>} : vector<8x8xf32>, vector<8x8xf32>, vector<8x8xf32> -> vector<8x8xf32>
    %64 = vector.extract_strided_slice %28 {offsets = [0, 16], sizes = [8, 8], strides = [1, 1]} : vector<8x32xf32> to vector<8x8xf32>
    %65 = vector.extract_strided_slice %31 {offsets = [16, 0], sizes = [8, 8], strides = [1, 1]} : vector<32x8xf32> to vector<8x8xf32>
    %cst_21 = arith.constant dense<0.000000e+00> : vector<8x8xf32>
    %66 = tpu.matmul %64, %65, %cst_21 {dimension_numbers = #tpu.dot_dimension_numbers<[1], [0], [0], [1], [0, 0, 1, 1], [], []>, precision = #tpu.contract_precision<fp32>} : vector<8x8xf32>, vector<8x8xf32>, vector<8x8xf32> -> vector<8x8xf32>
    %67 = arith.addf %66, %33 : vector<8x8xf32>
    %cst_22 = arith.constant dense<0xFF800000> : vector<8xf32>
    %68 = vector.multi_reduction <maximumf>, %67, %cst_22 [1] : vector<8x8xf32> to vector<8xf32>
    %69 = vector.shape_cast %68 : vector<8xf32> to vector<8x1xf32>
    %70 = vector.broadcast %69 : vector<8x1xf32> to vector<8x8xf32>
    %71 = arith.subf %67, %70 : vector<8x8xf32>
    %72 = math.exp %71 : vector<8x8xf32>
    %cst_23 = arith.constant dense<0.000000e+00> : vector<8xf32>
    %73 = vector.multi_reduction <add>, %72, %cst_23 [1] : vector<8x8xf32> to vector<8xf32>
    %74 = vector.shape_cast %73 : vector<8xf32> to vector<8x1xf32>
    %75 = vector.broadcast %74 : vector<8x1xf32> to vector<8x8xf32>
    %76 = arith.divf %72, %75 : vector<8x8xf32>
    %77 = vector.extract_strided_slice %30 {offsets = [0, 16], sizes = [8, 8], strides = [1, 1]} : vector<8x32xf32> to vector<8x8xf32>
    %cst_24 = arith.constant dense<0.000000e+00> : vector<8x8xf32>
    %78 = tpu.matmul %76, %77, %cst_24 {dimension_numbers = #tpu.dot_dimension_numbers<[1], [0], [0], [1], [0, 0, 1, 1], [], []>, precision = #tpu.contract_precision<fp32>} : vector<8x8xf32>, vector<8x8xf32>, vector<8x8xf32> -> vector<8x8xf32>
    %79 = vector.extract_strided_slice %28 {offsets = [0, 24], sizes = [8, 8], strides = [1, 1]} : vector<8x32xf32> to vector<8x8xf32>
    %80 = vector.extract_strided_slice %31 {offsets = [24, 0], sizes = [8, 8], strides = [1, 1]} : vector<32x8xf32> to vector<8x8xf32>
    %cst_25 = arith.constant dense<0.000000e+00> : vector<8x8xf32>
    %81 = tpu.matmul %79, %80, %cst_25 {dimension_numbers = #tpu.dot_dimension_numbers<[1], [0], [0], [1], [0, 0, 1, 1], [], []>, precision = #tpu.contract_precision<fp32>} : vector<8x8xf32>, vector<8x8xf32>, vector<8x8xf32> -> vector<8x8xf32>
    %82 = arith.addf %81, %33 : vector<8x8xf32>
    %cst_26 = arith.constant dense<0xFF800000> : vector<8xf32>
    %83 = vector.multi_reduction <maximumf>, %82, %cst_26 [1] : vector<8x8xf32> to vector<8xf32>
    %84 = vector.shape_cast %83 : vector<8xf32> to vector<8x1xf32>
    %85 = vector.broadcast %84 : vector<8x1xf32> to vector<8x8xf32>
    %86 = arith.subf %82, %85 : vector<8x8xf32>
    %87 = math.exp %86 : vector<8x8xf32>
    %cst_27 = arith.constant dense<0.000000e+00> : vector<8xf32>
    %88 = vector.multi_reduction <add>, %87, %cst_27 [1] : vector<8x8xf32> to vector<8xf32>
    %89 = vector.shape_cast %88 : vector<8xf32> to vector<8x1xf32>
    %90 = vector.broadcast %89 : vector<8x1xf32> to vector<8x8xf32>
    %91 = arith.divf %87, %90 : vector<8x8xf32>
    %92 = vector.extract_strided_slice %30 {offsets = [0, 24], sizes = [8, 8], strides = [1, 1]} : vector<8x32xf32> to vector<8x8xf32>
    %cst_28 = arith.constant dense<0.000000e+00> : vector<8x8xf32>
    %93 = tpu.matmul %91, %92, %cst_28 {dimension_numbers = #tpu.dot_dimension_numbers<[1], [0], [0], [1], [0, 0, 1, 1], [], []>, precision = #tpu.contract_precision<fp32>} : vector<8x8xf32>, vector<8x8xf32>, vector<8x8xf32> -> vector<8x8xf32>
    %94 = tpu.concatenate %48, %63, %78, %93 in 1 : vector<8x8xf32>, vector<8x8xf32>, vector<8x8xf32>, vector<8x8xf32> -> vector<8x32xf32>
    %cst_29 = arith.constant dense<0.000000e+00> : vector<8x32xf32>
    %95 = tpu.matmul %94, %6, %cst_29 {dimension_numbers = #tpu.dot_dimension_numbers<[1], [0], [0], [1], [0, 0, 1, 1], [], []>, precision = #tpu.contract_precision<fp32>} : vector<8x32xf32>, vector<32x32xf32>, vector<8x32xf32> -> vector<8x32xf32>
    %96 = vector.broadcast %10 : vector<1x32xf32> to vector<8x32xf32>
    %97 = arith.addf %95, %96 : vector<8x32xf32>
    %98 = arith.addf %24, %97 : vector<8x32xf32>
    %cst_30 = arith.constant dense<0.000000e+00> : vector<8x32xf32>
    %99 = tpu.matmul %98, %7, %cst_30 {dimension_numbers = #tpu.dot_dimension_numbers<[1], [0], [0], [1], [0, 0, 1, 1], [], []>, precision = #tpu.contract_precision<fp32>} : vector<8x32xf32>, vector<32x32xf32>, vector<8x32xf32> -> vector<8x32xf32>
    %100 = vector.broadcast %11 : vector<1x32xf32> to vector<8x32xf32>
    %101 = arith.addf %99, %100 : vector<8x32xf32>
    %cst_31 = arith.constant 5.000000e-01 : f32
    %102 = vector.broadcast %cst_31 : f32 to vector<8x32xf32>
    %103 = arith.mulf %102, %101 : vector<8x32xf32>
    %cst_32 = arith.constant 0.707106769 : f32
    %104 = vector.broadcast %cst_32 : f32 to vector<8x32xf32>
    %105 = arith.mulf %101, %104 : vector<8x32xf32>
    %106 = math.erf %105 : vector<8x32xf32>
    %cst_33 = arith.constant 1.000000e+00 : f32
    %107 = vector.broadcast %cst_33 : f32 to vector<8x32xf32>
    %108 = arith.addf %107, %106 : vector<8x32xf32>
    %109 = arith.mulf %103, %108 : vector<8x32xf32>
    %110 = arith.addf %98, %109 : vector<8x32xf32>
    %cst_34 = arith.constant dense<0.000000e+00> : vector<8xf32>
    %111 = vector.multi_reduction <add>, %110, %cst_34 [1] : vector<8x32xf32> to vector<8xf32>
    %112 = vector.shape_cast %111 : vector<8xf32> to vector<8x1xf32>
    %cst_35 = arith.constant 3.200000e+01 : f32
    %113 = vector.broadcast %cst_35 : f32 to vector<8x1xf32>
    %114 = arith.divf %112, %113 : vector<8x1xf32>
    %115 = vector.broadcast %114 : vector<8x1xf32> to vector<8x32xf32>
    %116 = arith.subf %110, %115 : vector<8x32xf32>
    %117 = arith.mulf %116, %116 : vector<8x32xf32>
    %cst_36 = arith.constant dense<0.000000e+00> : vector<8xf32>
    %118 = vector.multi_reduction <add>, %117, %cst_36 [1] : vector<8x32xf32> to vector<8xf32>
    %119 = vector.shape_cast %118 : vector<8xf32> to vector<8x1xf32>
    %cst_37 = arith.constant 3.200000e+01 : f32
    %120 = vector.broadcast %cst_37 : f32 to vector<8x1xf32>
    %121 = arith.divf %119, %120 : vector<8x1xf32>
    %cst_38 = arith.constant 9.99999974E-6 : f32
    %122 = vector.broadcast %cst_38 : f32 to vector<8x1xf32>
    %123 = arith.addf %121, %122 : vector<8x1xf32>
    %124 = math.rsqrt %123 : vector<8x1xf32>
    %125 = vector.broadcast %124 : vector<8x1xf32> to vector<8x32xf32>
    %126 = arith.mulf %116, %125 : vector<8x32xf32>
    %127 = vector.broadcast %12 : vector<1x32xf32> to vector<8x32xf32>
    %128 = arith.mulf %126, %127 : vector<8x32xf32>
    %129 = vector.broadcast %13 : vector<1x32xf32> to vector<8x32xf32>
    %130 = arith.addf %128, %129 : vector<8x32xf32>
    %c0_39 = arith.constant 0 : index
    %c0_40 = arith.constant 0 : index
    %c0_41 = arith.constant 0 : index
    %131 = vector.load %arg5[%c0_39, %c0_40, %c0_41] : memref<1x8x32xf32, #tpu.memory_space<vmem>>, vector<1x8x32xf32>
    %132 = vector.shape_cast %131 : vector<1x8x32xf32> to vector<8x32xf32>
    %133 = vector.shape_cast %130 : vector<8x32xf32> to vector<1x8x32xf32>
    tpu.vector_store %arg5[%c0_39, %c0_40, %c0_41], %133 {strides = array<i32>} : memref<1x8x32xf32, #tpu.memory_space<vmem>>, vector<1x8x32xf32>,
    return
  }
  func.func @transform_0(%arg0: i32) -> (i32, i32, i32) {
    %c0_i32 = arith.constant 0 : i32
    %c0_i32_0 = arith.constant 0 : i32
    %c0_i32_1 = arith.constant 0 : i32
    return %arg0, %c0_i32, %c0_i32_0 : i32, i32, i32
  }
  func.func @transform_1(%arg0: i32) -> (i32, i32, i32) {
    %c0_i32 = arith.constant 0 : i32
    %c0_i32_0 = arith.constant 0 : i32
    %c0_i32_1 = arith.constant 0 : i32
    return %arg0, %c0_i32, %c0_i32_0 : i32, i32, i32
  }
  func.func @transform_2(%arg0: i32) -> (i32, i32) {
    %c0_i32 = arith.constant 0 : i32
    %c0_i32_0 = arith.constant 0 : i32
    %c0_i32_1 = arith.constant 0 : i32
    return %c0_i32, %c0_i32_0 : i32, i32
  }
  func.func @transform_3(%arg0: i32) -> (i32, i32) {
    %c0_i32 = arith.constant 0 : i32
    %c0_i32_0 = arith.constant 0 : i32
    %c0_i32_1 = arith.constant 0 : i32
    return %c0_i32, %c0_i32_0 : i32, i32
  }
  func.func @transform_4(%arg0: i32) -> (i32, i32, i32) {
    %c0_i32 = arith.constant 0 : i32
    %c0_i32_0 = arith.constant 0 : i32
    %c0_i32_1 = arith.constant 0 : i32
    return %arg0, %c0_i32, %c0_i32_0 : i32, i32, i32
  }
}

</mosaic_0001>

<bundles_post_ra>
// kernel: tpu_custom_call.1
= control target key start
LH: loop header
LB: loop body
LE: loop exit
PB: predicated region body
PF: predicated region fallthrough
CT: control target
= control target key end

     0   :  { %s8033_s0 = inlined_call_operand.hbm [shape: f32[2,8,32], index: 0, kind: input, shape index: {}]   ;;  %s8034_s1 = inlined_call_operand.hbm [shape: f32[2,8,8], index: 1, kind: input, shape index: {}]   ;;  %s8035_s2 = inlined_call_operand.hbm [shape: f32[32,192], index: 2, kind: input, shape index: {}]   ;;  %s8036_s3 = inlined_call_operand.hbm [shape: f32[8,96], index: 3, kind: input, shape index: {}]   ;;  %s8037_s4 = inlined_call_operand.hbm [shape: f32[2,8,32], index: 4, kind: output, shape index: {}]  }
   0x1   :  { %8042 = sst [smem:[#allocation16_spill]] %s8035_s2 }
   0x2   :  { %9 = vsyncpa [#allocation3], 0 }
   0x3   :  { %11 = vsyncpa [#allocation3 + $0x1], 0 }
   0x4   :  { %12 = vsyncpa [#allocation6], 0 }
   0x5   :  { %14 = vsyncpa [#allocation6 + $0x1], 0 }
   0x6   :  { %15 = vsyncpa [#allocation9], 0 }
   0x7   :  { %16 = vsyncpa [#allocation4], 0 }
   0x8   :  { %18 = vsyncpa [#allocation4 + $0x1], 0  ;;  %s7223_s15 = smov 0   ;;  %s7225_s16 = smov 0  }
   0x9   :  { %s7227_s17 = smov 0   ;;  %s7229_s18 = smov 0  }
   0xa LB: > { %s7244_s19 = sadd.s32 4294967295, %s7173_s18   ;;  %s6137_s20 = sadd.s32 4294967294, %s7173_s18   ;;  %s7173_s18 = sphi %s7229_s18, %s8063_s18   ;;  %s7169_s17 = sphi %s7227_s17, %s8062_s17   ;;  %s7165_s16 = sphi %s7225_s16, %s8061_s16   ;;  %s7161_s15 = sphi %s7223_s15, %s8060_s15  }
   0xb   : > { %p44_p0 = scmp.ne.s32.totalorder %s7165_s16, %s7161_s15  ;;  %p8038_p1 = scmp.eq.s32.totalorder %s7244_s19, 0 }
   0xc   : > { %p142_p3 = scmp.eq.s32.totalorder %s6137_s20, 1  ;;  %p6138_p5 = scmp.ge.s32.totalorder %s7173_s18, 1 }
   0xd   : > { %p7253_p4 = por %p8038_p1, %p44_p0  ;;  %p149_p7 = scmp.lt.s32.totalorder %s7173_s18, 3 }
   0xe   : > { %p7258_p6 = por %p142_p3, %p44_p0  ;;  %s7175_s24 = smov [#allocation7]  }
   0xf   : > { %s8043_s21 = scalar_select %p7253_p4, 1, 0 }
  0x10   : > { %s8044_s22 = scalar_select %p7258_p6, 1, 0 }
  0x11   : > { %p7263_p8 = pnand %p6138_p5, %p149_p7  ;;  %s161_s25 = sshll.u32 %s7175_s24, 4  ;;  %s162_s25 = int_to_ptr.vmem [resolvable:$true] %s161_s25 }
  0x12   : > { %s7176_s27 = smov [#allocation8]   ;;  %s7000_s29 = scalar_lea.vmem %s162_s25, 1024 }
  0x13   : > { %s8045_s23 = scalar_select %p7263_p8, 1, 0 }
  0x14   : > { %p6890_p9 = pneg %p7263_p8  ;;  %s175_s28 = sshll.u32 %s7176_s27, 4  ;;  %s176_s28 = int_to_ptr.vmem [resolvable:$true] %s175_s28 }
  0x15   : > { %p7001_p13 = scmp.ne.s32.totalorder %s162_s25, %s7000_s29  ;;  %p7008_p5 = scmp.lt.s32.totalorder %s162_s25, %s162_s25 }
  0x16   : > { %p7272_p11 = pnand %p6890_p9, %p8038_p1  ;;  %p7009_p7 = scmp.lt.s32.totalorder %s7000_s29, %s7000_s29 }
  0x18   : > { %p6991_p12 = pneg %p7272_p11  ;;  %p7010_p10 = por %p7009_p7, %p7008_p5 }
  0x1a   : > { %p7003_p0 = pnand %p7001_p13, %p6991_p12 }
  0x1c   : > { %p7004_p3 = pneg %p7003_p0 }
  0x1e   : > { %p7011_p9 = pnand %p7010_p10, %p7004_p3 }
  0x20   : > { %7014 = shalt.err (!%p7011_p9)
}
  0x21   : > { %s7177_s30 = smov 256   ;;  %s7178_s5 = smov 16  }
  0x22   : > { %s8047_s2 = sld [smem:[#allocation16_spill]]  ;;  %s7026_s8 = scalar_lea.vmem %s176_s28, 128 }
  0x23   : > { %p7027_p1 = scmp.ne.s32.totalorder %s176_s28, %s7026_s8  ;;  %p7034_p2 = scmp.lt.s32.totalorder %s176_s28, %s176_s28 }
  0x24   : > { %p7035_p6 = scmp.lt.s32.totalorder %s7026_s8, %s7026_s8 }
  0x25   : > { %p7029_p13 = pnand %p7027_p1, %p6991_p12 }
  0x26   : > { %p7036_p5 = por %p7035_p6, %p7034_p2 }
  0x27   : > { %p7030_p0 = pneg %p7029_p13 }
  0x28   : > { %6893 = dma.hbm_to_vmem [thread:$0]  (!%p7272_p11), %s8047_s2, 1024, %s162_s25, [#allocation6], %s7177_s30, %s7177_s30, %s7178_s5  }
  0x29   : > { %p7037_p10 = pnand %p7036_p5, %p7030_p0 }
  0x2b   : > { %7040 = shalt.err (!%p7037_p10)
}
  0x2c   : > { %6896 = dma.hbm_to_vmem [thread:$0]  (!%p7272_p11), %s8036_s3, 128, %s176_s28, [#allocation9]  }
  0x2d   : > { %s7295_s11 = sadd.s32 1, %s7173_s18   ;;  %s31_s12 = sadd.s32 1, %s7169_s17 }
  0x2e   : > { %s28_s13 = ssub.s32 %s7173_s18, %s7295_s11  ;;  %p38_p1 = scmp.ne.s32.totalorder %s7169_s17, %s7165_s16 }
  0x2f   : > { %p29_p2 = scmp.eq.s32.totalorder %s28_s13, 0  ;;  %p39_p6 = scmp.eq.s32.totalorder %s7173_s18, 0 }
  0x30   : > { %p8048_p12 = scmp.eq.s32.totalorder %s7244_s19, 1  ;;  %p6910_p7 = scmp.lt.s32.totalorder %s7173_s18, 2 }
  0x31   : > { %s7311_s20 = scalar_select %p29_p2, %s7169_s17, %s31_s12  }
  0x32   : > { %p7305_p3 = por %p8048_p12, %p38_p1  ;;  %p40_p9 = por %p39_p6, %p38_p1 }
  0x33   : > { %s186_s24 = sand.u32 1, %s7169_s17   ;;  %s6143_s26 = sshll.u32 %s7173_s18, 7 }
  0x34   : > { %s8049_s14 = scalar_select %p7305_p3, 1, 0 }
  0x35   : > { %s7314_s25 = sshll.u32 %s186_s24, 3  ;;  %s7320_s29 = scalar_lea.hbm %s8033_s0, %s6143_s26 }
  0x36   : > { %s190_s30 = scalar_lea.vmem [#allocation2], %s7314_s25  ;;  %p7325_p11 = pnand %p6910_p7, %p40_p9 }
  0x37   : > { %s197_s5 = sshll.u32 %s190_s30, 4  ;;  %s7332_s9 = scalar_lea.hbm %s8034_s1, %s6143_s26  ;;  %s7323_s5 = int_to_ptr.vmem [resolvable:$true] %s197_s5 }
  0x38   : > { %s204_s10 = sand.u32 1, %s7173_s18   ;;  %s187_s12 = scalar_lea.sflag [#allocation3], %s186_s24 }
  0x39   : > { %s7041_s13 = scalar_lea.hbm %s7320_s29, 128  ;;  %p7043_p0 = pneg %p7325_p11 }
  0x3a   : > { %p7042_p13 = scmp.ne.s32.totalorder %s7320_s29, %s7041_s13  ;;  %s7046_s30 = scalar_lea.hbm %s8033_s0, 256 }
  0x3b   : > { %p7047_p1 = scmp.lt.s32.totalorder %s7320_s29, %s8033_s0  ;;  %p7048_p2 = scmp.lt.s32.totalorder %s7046_s30, %s7041_s13 }
  0x3c   : > { %p7044_p5 = pnand %p7043_p0, %p7042_p13 }
  0x3d   : > { %p7049_p6 = por %p7048_p2, %p7047_p1 }
  0x3e   : > { %p7045_p10 = pneg %p7044_p5 }
  0x40   : > { %p7050_p12 = pnand %p7049_p6, %p7045_p10 }
  0x42   : > { %7053 = shalt.err (!%p7050_p12)
}
  0x43   : > { %s7054_s24 = scalar_lea.vmem %s7323_s5, 128  ;;  %s7179_s26 = smov [#allocation2]  }
  0x44   : > { %p7055_p7 = scmp.ne.s32.totalorder %s7323_s5, %s7054_s24  ;;  %s7059_s8 = sshll.u32 %s7179_s26, 4  ;;  %s7060_s8 = int_to_ptr.vmem [resolvable:$false] %s7059_s8 }
  0x45   : > { %s7061_s27 = scalar_lea.vmem %s7060_s8, 256  ;;  %p7062_p5 = scmp.lt.s32.totalorder %s7323_s5, %s7060_s8 }
  0x46   : > { %p7057_p9 = pnand %p7055_p7, %p7043_p0  ;;  %p7063_p3 = scmp.lt.s32.totalorder %s7061_s27, %s7054_s24 }
  0x48   : > { %p7058_p13 = pneg %p7057_p9  ;;  %p7064_p4 = por %p7063_p3, %p7062_p5 }
  0x4a   : > { %p7065_p1 = pnand %p7064_p4, %p7058_p13 }
  0x4c   : > { %7068 = shalt.err (!%p7065_p1)
}
  0x4d   : > { %6900 = dma.hbm_to_vmem [thread:$0]  (!%p7325_p11), %s7320_s29, 128, %s7323_s5, %s187_s12  }
  0x4e   : > { %s208_s2 = scalar_lea.vmem [#allocation5], %s7314_s25  ;;  %s205_s28 = scalar_lea.sflag [#allocation6], %s204_s10 }
  0x4f   : > { %s215_s13 = sshll.u32 %s208_s2, 4  ;;  %s7069_s30 = scalar_lea.hbm %s7332_s9, 128  ;;  %s216_s13 = int_to_ptr.vmem [resolvable:$true] %s215_s13 }
  0x50   : > { %p7070_p3 = scmp.ne.s32.totalorder %s7332_s9, %s7069_s30  ;;  %s7074_s26 = scalar_lea.hbm %s8034_s1, 256 }
  0x51   : > { %p7075_p2 = scmp.lt.s32.totalorder %s7332_s9, %s8034_s1  ;;  %p7076_p6 = scmp.lt.s32.totalorder %s7074_s26, %s7069_s30 }
  0x52   : > { %p7072_p4 = pnand %p7070_p3, %p7043_p0 }
  0x53   : > { %p7077_p12 = por %p7076_p6, %p7075_p2 }
  0x54   : > { %p7073_p10 = pneg %p7072_p4 }
  0x56   : > { %p7078_p7 = pnand %p7077_p12, %p7073_p10 }
  0x58   : > { %7081 = shalt.err (!%p7078_p7)
}
  0x59   : > { %s7082_s25 = scalar_lea.vmem %s216_s13, 128  ;;  %s7180_s29 = smov [#allocation5]  }
  0x5a   : > { %p7083_p9 = scmp.ne.s32.totalorder %s216_s13, %s7082_s25  ;;  %s7087_s5 = sshll.u32 %s7180_s29, 4  ;;  %s7088_s5 = int_to_ptr.vmem [resolvable:$false] %s7087_s5 }
  0x5b   : > { %s7089_s10 = scalar_lea.vmem %s7088_s5, 256  ;;  %p7090_p1 = scmp.lt.s32.totalorder %s216_s13, %s7088_s5 }
  0x5c   : > { %p7085_p13 = pnand %p7083_p9, %p7043_p0  ;;  %p7091_p3 = scmp.lt.s32.totalorder %s7089_s10, %s7082_s25 }
  0x5e   : > { %p7086_p5 = pneg %p7085_p13  ;;  %p7092_p4 = por %p7091_p3, %p7090_p1 }
  0x60   : > { %p7093_p8 = pnand %p7092_p4, %p7086_p5 }
  0x62   : > { %7096 = shalt.err (!%p7093_p8)
}
  0x63   : > { %6903 = dma.hbm_to_vmem [thread:$0]  (!%p7325_p11), %s7332_s9, 128, %s216_s13, %s205_s28  }
  0x64   : > { %p8051_p10 = scmp.ne.s32.totalorder %s8045_s23, 0 }
  0x65   : > { %s7383_s12 = sand.u32 (!%p8051_p10), 1, %s7165_s16   ;;  %p8052_p0 = scmp.ne.s32.totalorder (!%p8051_p10), %s8043_s21, 0 }
  0x66   : > { %224 = sbr.rel (%p8051_p10) target bundleno = 3989 (0xf95), region = 36  ;;  %s7386_s2 = sshll.u32 (!%p8051_p10), %s7383_s12, 3 }
  0x67   : > { %s227_s30 = scalar_lea.sflag (!%p8051_p10), [#allocation3], %s7383_s12  ;;  %s230_s7 = scalar_lea.vmem (!%p8051_p10), [#allocation2], %s7386_s2 }
  0x6b   : > { %7140 = dma.done.wait (%p8052_p0), %s227_s30, 128  }
  0x6c   : > { %7142 = vsyncadd (%p8052_p0), %s227_s30, 4294967168  ;;  %s235_s23 = sand.u32 1, %s7244_s19   ;;  %s239_s9 = scalar_lea.vmem [#allocation5], %s7386_s2 }
  0x6d   : > { %s236_s6 = scalar_lea.sflag [#allocation6], %s235_s23 }
  0x6e   : > { %7144 = dma.done.wait (%p8052_p0), %s236_s6, 128  }
  0x6f   : > { %7146 = vsyncadd (%p8052_p0), %s236_s6, 4294967168  ;;  %p8053_p8 = scmp.eq.s32.totalorder %s7244_s19, 0 }
  0x71   : > { %7148 = dma.done.wait (%p8053_p8), [#allocation6], 1024   ;;  %p8054_p11 = pmov %p8053_p8 }
  0x72   : > { %p8055_p2 = pmov %p8053_p8 }
  0x73   : > { %7150 = vsyncadd (%p8054_p11), [#allocation6], 4294966272 }
  0x74   : > { %7152 = dma.done.wait (%p8055_p2), [#allocation9], 128   ;;  %p8056_p6 = pmov %p8055_p2 }
  0x75   : > { %v7181_v0 = vmov 0.0   ;;  %vm7182_vm0 = vmmov 0   ;;  %vm291_vm1 = vcmask 261120   ;;  %v284_v1 = vld [vmem:[#allocation7 + $0x30] sm:$0xff]  ;;  %v282_v2 = vld [vmem:[#allocation7 + $0x20] sm:$0xff]  ;;  %s7183_s21 = smov 96   ;;  %v287_v56 = vlaneseq }
  0x76   : > { %7154 = vsyncadd (%p8056_p6), [#allocation9], 4294967168  ;;  %6372 = vmatprep.subr.mxu0 %v7181_v0  ;;  %6383 = vmatprep.subr.mxu1 %v7181_v0  ;;  %v280_v3 = vld [vmem:[#allocation7 + $0x10] sm:$0xff]  ;;  %v7414_v4 = vand.u32 4294901760, %v284_v1  ;;  %v7416_v5 = vand.u32 4294901760, %v282_v2  ;;  %v278_v7 = vld [vmem:[#allocation7] sm:$0xff] }
  0x77   : > { %6380 = vmatprep.mubr.msk.f32.mxu0 %vm7182_vm0, %v7181_v0  ;;  %6391 = vmatprep.mubr.msk.f32.mxu1 %vm7182_vm0, %v7181_v0  ;;  %v7418_v6 = vand.u32 4294901760, %v280_v3  ;;  %v277_v8 = vld [vmem:[%s230_s7] sm:$0xff]  ;;  %v7422_v9 = vand.u32 4294901760, %v278_v7  ;;  %v7533_v57 = vshrl.u32 %v287_v56, 7  ;;  %vm1297_vm2 = vcmask 64512   ;;  %s7184_s13 = smov 88  }
  0x78   : > { %799 = vrot.lane.b32.xlu0 %v284_v1, %s7183_s21  ;;  %795 = vrot.lane.b32.xlu1 %v280_v3, %s7183_s21  ;;  %v293_v10 = vsel %vm291_vm1, %v277_v8, 0  ;;  %v400_v11 = vsub.f32 %v284_v1, %v7414_v4  ;;  %v407_v13 = vsub.f32 %v282_v2, %v7416_v5  ;;  %v7536_v61 = vld [vmem:[#allocation8] sm:$0xff]  ;;  %s7185_s28 = smov 120   ;;  %s7186_s24 = smov 64   ;;  %vm4975_vm3 = vcmask 130048  }
  0x79   : > { %6373 = vmatpush3.msra.mxu0 %v7414_v4  ;;  %v7427_v12 = vand.u32 4294901760, %v293_v10  ;;  %v414_v14 = vsub.f32 %v280_v3, %v7418_v6  ;;  %v421_v15 = vsub.f32 %v278_v7, %v7422_v9  ;;  %v289_v59 = vsub.s32 0, %v7533_v57  ;;  %s7187_s26 = smov 56   ;;  %s7188_s8 = smov 112  }
  0x7a   : > { %6374 = vmatprep.subr.mxu0 %v7181_v0  ;;  %v401_v16 = vand.u32 4294901760, %v400_v11  ;;  %v408_v18 = vand.u32 4294901760, %v407_v13  ;;  %s7189_s27 = smov 80   ;;  %s7190_s25 = smov 72   ;;  %vm4977_vm4 = vcmask 195584  }
  0x7b   : > { %6375 = vmatpush3.msra.mxu0 %v7416_v5  ;;  %v365_v17 = vsub.f32 %v293_v10, %v7427_v12  ;;  %v415_v19 = vand.u32 4294901760, %v414_v14  ;;  %v422_v20 = vand.u32 4294901760, %v421_v15  ;;  %v290_v63 = vrot.slane %v7536_v61, %v289_v59  ;;  %s7191_s29 = smov 104   ;;  %s7192_s5 = smov 48  }
  0x7c   : > { %797 = vrot.lane.b32.xlu0 %v282_v2, %s7183_s21  ;;  %6376 = vmatprep.subr.mxu0 %v7181_v0  ;;  %v402_v21 = vsub.f32 %v400_v11, %v401_v16  ;;  %v409_v23 = vsub.f32 %v407_v13, %v408_v18  ;;  %s7193_s10 = smov 40   ;;  %s7194_s30 = smov 16  }
  0x7d   : > { %793 = vrot.lane.b32.xlu1 %v278_v7, %s7183_s21  ;;  %6377 = vmatpush3.msra.mxu0 %v7418_v6  ;;  %v366_v22 = vand.u32 4294901760, %v365_v17  ;;  %v416_v24 = vsub.f32 %v414_v14, %v415_v19  ;;  %v423_v28 = vsub.f32 %v421_v15, %v422_v20  ;;  %s7195_s7 = smov 8   ;;  %s7196_s23 = smov 24  }
  0x7e   : > { %6378 = vmatprep.subr.mxu0 %v7181_v0  ;;  %v403_v25 = vand.u32 4294901760, %v402_v21  ;;  %v410_v27 = vand.u32 4294901760, %v409_v23  ;;  %s6153_s6 = sshll.u32 %s7244_s19, 7  ;;  %p8057_p7 = scmp.ne.s32.totalorder %s8049_s14, 0 }
  0x7f   : > { %6379 = vmatpush3.msra.mxu0 %v7422_v9  ;;  %v367_v26 = vsub.f32 %v365_v17, %v366_v22  ;;  %v417_v30 = vand.u32 4294901760, %v416_v24  ;;  %v424_v31 = vand.u32 4294901760, %v423_v28 }
  0x80   : > { %6394 = vmatprep.subr.mxu0 %v7181_v0  ;;  %6384 = vmatpush3.msra.mxu1 %v403_v25 }
  0x81   : > { %v368_v29 = vand.u32 4294901760, %v367_v26  ;;  %6385 = vmatprep.subr.mxu1 %v7181_v0 }
  0x82   : > { %6386 = vmatpush3.msra.mxu1 %v410_v27 }
  0x83   : > { %6381 = vmatmul.mubr.f32.vlgmr.msra.gmra.mxu0 %v368_v29  ;;  %6387 = vmatprep.subr.mxu1 %v7181_v0  ;;  %v787_v29 = vsub.s32 1, %v7533_v57 }
  0x84   : > { %6395 = vmatpush3.msra.mxu0 %v400_v11  ;;  %6388 = vmatpush3.msra.mxu1 %v417_v30 }
  0x85   : > { %6396 = vmatprep.subr.mxu0 %v7181_v0  ;;  %6389 = vmatprep.subr.mxu1 %v7181_v0 }
  0x86   : > { %6397 = vmatpush3.msra.mxu0 %v407_v13  ;;  %6390 = vmatpush3.msra.mxu1 %v424_v31 }
  0x87   : > { %6398 = vmatprep.subr.mxu0 %v7181_v0  ;;  %6392 = vmatmul.mubr.f32.vlgmr.msra.gmra.mxu1 %v7427_v12 }
  0x88   : > { %6399 = vmatpush3.msra.mxu0 %v414_v14  ;;  %6405 = vmatprep.subr.mxu1 %v7181_v0 }
  0x89   : > { %6400 = vmatprep.subr.mxu0 %v7181_v0  ;;  %6406 = vmatpush3.msra.mxu1 %v7414_v4 }
  0x8a   : > { %6401 = vmatpush3.msra.mxu0 %v421_v15  ;;  %6402 = vmatprep.mubr.msk.f32.mxu0 %vm7182_vm0, %v7181_v0 }
  0x8b   : > { %6407 = vmatprep.subr.mxu1 %v7181_v0  ;;  %6416 = vmatprep.subr.mxu0 %v7181_v0 }
  0x8c   : > { %6403 = vmatmul.mubr.f32.vlgmr.msra.gmra.mxu0 %v365_v17  ;;  %6408 = vmatpush3.msra.mxu1 %v7416_v5 }
  0x8d   : > { %6417 = vmatpush3.msra.mxu0 %v401_v16  ;;  %6409 = vmatprep.subr.mxu1 %v7181_v0 }
  0x8e   : > { %6418 = vmatprep.subr.mxu0 %v7181_v0  ;;  %6410 = vmatpush3.msra.mxu1 %v7418_v6 }
  0x8f   : > { %6419 = vmatpush3.msra.mxu0 %v408_v18  ;;  %6411 = vmatprep.subr.mxu1 %v7181_v0 }
  0x90   : > { %6420 = vmatprep.subr.mxu0 %v7181_v0  ;;  %6412 = vmatpush3.msra.mxu1 %v7422_v9 }
  0x91   : > { %6413 = vmatprep.mubr.msk.f32.mxu1 %vm7182_vm0, %v7181_v0  ;;  %6421 = vmatpush3.msra.mxu0 %v415_v19 }
  0x92   : > { %6414 = vmatmul.mubr.f32.vlgmr.msra.gmra.mxu1 %v366_v22  ;;  %6422 = vmatprep.subr.mxu0 %v7181_v0 }
  0x93   : > { %6427 = vmatprep.subr.mxu1 %v7181_v0  ;;  %6423 = vmatpush3.msra.mxu0 %v422_v20 }
  0x94   : > { %6424 = vmatprep.mubr.msk.f32.mxu0 %vm7182_vm0, %v7181_v0  ;;  %6428 = vmatpush3.msra.mxu1 %v7414_v4 }
  0x95   : > { %6425 = vmatmul.mubr.f32.vlgmr.msra.gmra.mxu0 %v7427_v12  ;;  %6429 = vmatprep.subr.mxu1 %v7181_v0 }
  0x96   : > { %6435 = vmatprep.mubr.msk.f32.mxu1 %vm7182_vm0, %v7181_v0  ;;  %6430 = vmatpush3.msra.mxu1 %v7416_v5 }
  0x97   : > { %6438 = vmatprep.subr.mxu0 %v7181_v0  ;;  %6431 = vmatprep.subr.mxu1 %v7181_v0 }
  0x98   : > { %6446 = vmatprep.mubr.msk.f32.mxu0 %vm7182_vm0, %v7181_v0  ;;  %6432 = vmatpush3.msra.mxu1 %v7418_v6 }
  0x99   : > { %6433 = vmatprep.subr.mxu1 %v7181_v0 }
  0x9a   : > { %6434 = vmatpush3.msra.mxu1 %v7422_v9 }
  0x9b   : > { %6436 = vmatmul.mubr.f32.vlgmr.msra.gmra.mxu1 %v7427_v12  ;;  %6449 = vmatprep.subr.mxu1 %v7181_v0 }
  0x9c   : > { %6457 = vmatprep.mubr.msk.f32.mxu1 %vm7182_vm0, %v7181_v0 }
  0xea   : > { %v800_v32 = vpop.permute.xlu0 %799  ;;  %v796_v33 = vpop.permute.xlu1 %795 }
  0xeb   : > { %v7485_v34 = vand.u32 4294901760, %v800_v32  ;;  %v7487_v35 = vand.u32 4294901760, %v796_v33 }
  0xed   : > { %v7490_v36 = vsub.f32 %v800_v32, %v7485_v34  ;;  %v7493_v37 = vsub.f32 %v796_v33, %v7487_v35  ;;  %6439 = vmatpush3.msra.mxu0 %v7485_v34  ;;  %v788_v33 = vrot.slane %v7536_v61, %v787_v29 }
  0xee   : > { %v798_v38 = vpop.permute.xlu0 %797  ;;  %6440 = vmatprep.subr.mxu0 %v7181_v0 }
  0xef   : > { %v914_v39 = vand.u32 4294901760, %v7490_v36  ;;  %v7498_v40 = vand.u32 4294901760, %v798_v38  ;;  %v928_v41 = vand.u32 4294901760, %v7493_v37  ;;  %v794_v42 = vpop.permute.xlu1 %793 }
  0xf0   : > { %v7501_v43 = vand.u32 4294901760, %v794_v42 }
  0xf1   : > { %v915_v44 = vsub.f32 %v7490_v36, %v914_v39  ;;  %v7507_v45 = vsub.f32 %v798_v38, %v7498_v40  ;;  %6441 = vmatpush3.msra.mxu0 %v7498_v40  ;;  %v929_v49 = vsub.f32 %v7493_v37, %v928_v41 }
  0xf2   : > { %v7511_v46 = vsub.f32 %v794_v42, %v7501_v43  ;;  %6442 = vmatprep.subr.mxu0 %v7181_v0 }
  0xf3   : > { %v916_v47 = vand.u32 4294901760, %v915_v44  ;;  %v921_v48 = vand.u32 4294901760, %v7507_v45  ;;  %6443 = vmatpush3.msra.mxu0 %v7487_v35  ;;  %v930_v54 = vand.u32 4294901760, %v929_v49 }
  0xf4   : > { %v935_v50 = vand.u32 4294901760, %v7511_v46  ;;  %6444 = vmatprep.subr.mxu0 %v7181_v0 }
  0xf5   : > { %v922_v51 = vsub.f32 %v7507_v45, %v921_v48  ;;  %6450 = vmatpush3.msra.mxu1 %v916_v47  ;;  %6445 = vmatpush3.msra.mxu0 %v7501_v43 }
  0xf6   : > { %v936_v52 = vsub.f32 %v7511_v46, %v935_v50  ;;  %6451 = vmatprep.subr.mxu1 %v7181_v0  ;;  %6460 = vmatprep.subr.mxu0 %v7181_v0 }
  0xf7   : > { %v923_v53 = vand.u32 4294901760, %v922_v51 }
  0xf8   : > { %v937_v55 = vand.u32 4294901760, %v936_v52 }
  0xf9   : > { %6452 = vmatpush3.msra.mxu1 %v923_v53 }
  0xfa   : > { %6453 = vmatprep.subr.mxu1 %v7181_v0 }
  0xfb   : > { %6454 = vmatpush3.msra.mxu1 %v930_v54 }
  0xfc   : > { %6455 = vmatprep.subr.mxu1 %v7181_v0 }
  0xfd   : > { %6456 = vmatpush3.msra.mxu1 %v937_v55 }
  0xfe   : > { %6471 = vmatprep.subr.mxu1 %v7181_v0 }
 0x143   : > { %v370_v58 = vpop.f32.mrf.mxu0 }
 0x144   : > { %v371_v3 = vadd.f32 %v370_v58, %v290_v63  ;;  %v7620_v63 = vld [vmem:[%s239_s9] sm:$0xff]  ;;  %s276_s9 = scalar_lea.vmem [#allocation10], %s7386_s2 }
 0x145   : > { %v6382_v60 = vpop.f32.mrf.mxu0 }
 0x147   : > { %v461_v62 = vpop.f32.mrf.mxu1 }
 0x148   : > { %v462_v5 = vadd.f32 %v461_v62, %v371_v3 }
 0x149   : > { %v6393_v1 = vpop.f32.mrf.mxu1 }
 0x14c   : > { %v541_v2 = vpop.f32.mrf.mxu0 }
 0x14d   : > { %v542_v8 = vadd.f32 %v541_v2, %v462_v5 }
 0x14e   : > { %v6404_v4 = vpop.f32.mrf.mxu0 }
 0x152   : > { %v618_v6 = vpop.f32.mrf.mxu1 }
 0x153   : > { %v619_v10 = vadd.f32 %v618_v6, %v542_v8 }
 0x154   : > { %v6415_v7 = vpop.f32.mrf.mxu1 }
 0x155   : > { %v701_v9 = vpop.f32.mrf.mxu0 }
 0x156   : > { %v702_v12 = vadd.f32 %v701_v9, %v619_v10 }
 0x157   : > { %v6426_v11 = vpop.f32.mrf.mxu0 }
 0x15b   : > { %v776_v13 = vpop.f32.mrf.mxu1 }
 0x15c   : > { %v777_v14 = vadd.f32 %v776_v13, %v702_v12 }
 0x15d   : > { %v6437_v15 = vpop.f32.mrf.mxu1 }
 0x15e   : > { %v781_v16 = vmul.f32 0.70710677, %v777_v14  ;;  %v780_v18 = vmul.f32 0.5, %v777_v14 }
 0x160   : > { %6966 = verf.f32 %v781_v16 }
 0x16d   : > { %v6967_v17 = vpop.eup %6966 }
 0x16e   : > { %v783_v19 = vadd.f32 1.0, %v6967_v17 }
 0x170   : > { %v7539_v20 = vmul.f32 %v783_v19, %v780_v18 }
 0x172   : > { %v806_v21 = vsel %vm291_vm1, %v7539_v20, 0 }
 0x173   : > { %v877_v22 = vand.u32 4294901760, %v806_v21 }
 0x175   : > { %v878_v23 = vsub.f32 %v806_v21, %v877_v22  ;;  %6458 = vmatmul.mubr.f32.vlgmr.msra.gmra.mxu1 %v877_v22 }
 0x176   : > { %6472 = vmatpush3.msra.mxu1 %v7485_v34  ;;  %6479 = vmatprep.mubr.msk.f32.mxu1 %vm7182_vm0, %v7181_v0 }
 0x177   : > { %6473 = vmatprep.subr.mxu1 %v7181_v0  ;;  %v879_v24 = vand.u32 4294901760, %v878_v23 }
 0x178   : > { %6474 = vmatpush3.msra.mxu1 %v7498_v40 }
 0x179   : > { %6475 = vmatprep.subr.mxu1 %v7181_v0  ;;  %v880_v25 = vsub.f32 %v878_v23, %v879_v24 }
 0x17a   : > { %6476 = vmatpush3.msra.mxu1 %v7487_v35 }
 0x17b   : > { %6477 = vmatprep.subr.mxu1 %v7181_v0  ;;  %v881_v26 = vand.u32 4294901760, %v880_v25 }
 0x17c   : > { %6478 = vmatpush3.msra.mxu1 %v7501_v43 }
 0x17d   : > { %6480 = vmatmul.mubr.f32.vlgmr.msra.gmra.mxu1 %v879_v24  ;;  %6493 = vmatprep.subr.mxu1 %v7181_v0 }
 0x17e   : > { %6447 = vmatmul.mubr.f32.vlgmr.msra.gmra.mxu0 %v881_v26  ;;  %6494 = vmatpush3.msra.mxu1 %v7485_v34 }
 0x17f   : > { %6461 = vmatpush3.msra.mxu0 %v7490_v36  ;;  %6495 = vmatprep.subr.mxu1 %v7181_v0 }
 0x180   : > { %6462 = vmatprep.subr.mxu0 %v7181_v0  ;;  %6496 = vmatpush3.msra.mxu1 %v7498_v40 }
 0x181   : > { %6463 = vmatpush3.msra.mxu0 %v7507_v45  ;;  %6497 = vmatprep.subr.mxu1 %v7181_v0 }
 0x182   : > { %6464 = vmatprep.subr.mxu0 %v7181_v0  ;;  %6498 = vmatpush3.msra.mxu1 %v7487_v35 }
 0x183   : > { %6465 = vmatpush3.msra.mxu0 %v7493_v37  ;;  %6499 = vmatprep.subr.mxu1 %v7181_v0 }
 0x184   : > { %6466 = vmatprep.subr.mxu0 %v7181_v0  ;;  %6468 = vmatprep.mubr.msk.f32.mxu0 %vm7182_vm0, %v7181_v0 }
 0x185   : > { %6467 = vmatpush3.msra.mxu0 %v7511_v46  ;;  %6500 = vmatpush3.msra.mxu1 %v7501_v43 }
 0x186   : > { %6501 = vmatprep.mubr.msk.f32.mxu1 %vm7182_vm0, %v7181_v0  ;;  %6469 = vmatmul.mubr.f32.vlgmr.msra.gmra.mxu0 %v878_v23 }
 0x187   : > { %6482 = vmatprep.subr.mxu0 %v7181_v0  ;;  %6502 = vmatmul.mubr.f32.vlgmr.msra.gmra.mxu1 %v877_v22 }
 0x188   : > { %6483 = vmatpush3.msra.mxu0 %v914_v39  ;;  %6490 = vmatprep.mubr.msk.f32.mxu0 %vm7182_vm0, %v7181_v0 }
 0x189   : > { %6484 = vmatprep.subr.mxu0 %v7181_v0  ;;  %6509 = vmatprep.subr.mxu1 %v7181_v0 }
 0x18a   : > { %6485 = vmatpush3.msra.mxu0 %v921_v48  ;;  %6511 = vmatprep.mubr.msk.f32.mxu1 %vm7182_vm0, %v7181_v0 }
 0x18b   : > { %6486 = vmatprep.subr.mxu0 %v7181_v0 }
 0x18c   : > { %6487 = vmatpush3.msra.mxu0 %v928_v41 }
 0x18d   : > { %6488 = vmatprep.subr.mxu0 %v7181_v0 }
 0x18e   : > { %6489 = vmatpush3.msra.mxu0 %v935_v50 }
 0x18f   : > { %6491 = vmatmul.mubr.f32.vlgmr.msra.gmra.mxu0 %v877_v22  ;;  %6504 = vmatprep.subr.mxu0 %v7181_v0 }
 0x190   : > { %6506 = vmatprep.mubr.msk.f32.mxu0 %vm7182_vm0, %v7181_v0 }
 0x235   : > { %v974_v27 = vpop.f32.mrf.mxu1 }
 0x237   : > { %v6459_v28 = vpop.f32.mrf.mxu1 }
 0x23d   : > { %v1131_v30 = vpop.f32.mrf.mxu1 }
 0x23e   : > { %v883_v31 = vpop.f32.mrf.mxu0 }
 0x23f   : > { %v6481_v32 = vpop.f32.mrf.mxu1  ;;  %v884_v35 = vadd.f32 %v883_v31, %v788_v33 }
 0x240   : > { %v6448_v34 = vpop.f32.mrf.mxu0 }
 0x241   : > { %v975_v38 = vadd.f32 %v974_v27, %v884_v35 }
 0x246   : > { %v1054_v36 = vpop.f32.mrf.mxu0 }
 0x247   : > { %v1289_v37 = vpop.f32.mrf.mxu1  ;;  %v1055_v41 = vadd.f32 %v1054_v36, %v975_v38 }
 0x248   : > { %v6470_v39 = vpop.f32.mrf.mxu0 }
 0x249   : > { %v6503_v40 = vpop.f32.mrf.mxu1  ;;  %v1132_v42 = vadd.f32 %v1131_v30, %v1055_v41 }
 0x24f   : > { %v1214_v43 = vpop.f32.mrf.mxu0 }
 0x250   : > { %v1215_v44 = vadd.f32 %v1214_v43, %v1132_v42 }
 0x251   : > { %v6492_v45 = vpop.f32.mrf.mxu0 }
 0x252   : > { %v7593_v46 = vadd.f32 %v1289_v37, %v1215_v44 }
 0x254   : > { %1295 = vrot.lane.b32.xlu0 %v7593_v46, %s7183_s21  ;;  %v1298_v47 = vsel %vm1297_vm2, %v7593_v46, 0 }
 0x255   : > { %v1368_v48 = vand.u32 4294901760, %v1298_v47 }
 0x257   : > { %v1369_v49 = vsub.f32 %v1298_v47, %v1368_v48 }
 0x259   : > { %v1370_v50 = vand.u32 4294901760, %v1369_v49 }
 0x25b   : > { %v1371_v53 = vsub.f32 %v1369_v49, %v1370_v50 }
 0x25d   : > { %v1372_v56 = vand.u32 4294901760, %v1371_v53 }
 0x2c6   : > { %v1296_v51 = vpop.permute.xlu0 %1295 }
 0x2c7   : > { %v1300_v52 = vsel %vm1297_vm2, %v1296_v51, 0 }
 0x2c8   : > { %v1333_v54 = vand.u32 4294901760, %v1300_v52 }
 0x2ca   : > { %v1410_v55 = vsub.f32 %v1300_v52, %v1333_v54  ;;  %6505 = vmatpush3.xpose.msra.mxu0 %v1333_v54 }
 0x2cb   : > { %6514 = vmatprep.subr.mxu0 %v7181_v0 }
 0x2cc   : > { %v1411_v58 = vand.u32 4294901760, %v1410_v55 }
 0x2cd   : > { %6507 = vmatmul.mubr.f32.vlgmr.msra.gmra.mxu0 %v1372_v56 }
 0x2ce   : > { %v1412_v59 = vsub.f32 %v1410_v55, %v1411_v58  ;;  %6515 = vmatpush3.xpose.msra.mxu0 %v1410_v55  ;;  %6516 = vmatprep.mubr.msk.f32.mxu0 %vm7182_vm0, %v7181_v0 }
 0x2cf   : > { %6524 = vmatprep.subr.mxu0 %v7181_v0 }
 0x2d0   : > { %v1413_v60 = vand.u32 4294901760, %v1412_v59 }
 0x2d1   : > { %6517 = vmatmul.mubr.f32.vlgmr.msra.gmra.mxu0 %v1369_v49 }
 0x2d2   : > { %6510 = vmatpush3.xpose.msra.mxu1 %v1413_v60  ;;  %6525 = vmatpush3.xpose.msra.mxu0 %v1411_v58 }
 0x2d3   : > { %6526 = vmatprep.mubr.msk.f32.mxu0 %vm7182_vm0, %v7181_v0  ;;  %6519 = vmatprep.subr.mxu1 %v7181_v0 }
 0x2d4   : > { %6534 = vmatprep.subr.mxu0 %v7181_v0 }
 0x2d5   : > { %6512 = vmatmul.mubr.f32.vlgmr.msra.gmra.mxu1 %v1368_v48  ;;  %6527 = vmatmul.mubr.f32.vlgmr.msra.gmra.mxu0 %v1368_v48 }
 0x2d6   : > { %6520 = vmatpush3.xpose.msra.mxu1 %v1333_v54  ;;  %6521 = vmatprep.mubr.msk.f32.mxu1 %vm7182_vm0, %v7181_v0 }
 0x2d7   : > { %6529 = vmatprep.subr.mxu1 %v7181_v0  ;;  %6536 = vmatprep.mubr.msk.f32.mxu0 %vm7182_vm0, %v7181_v0 }
 0x2d9   : > { %6522 = vmatmul.mubr.f32.vlgmr.msra.gmra.mxu1 %v1370_v50 }
 0x2da   : > { %6530 = vmatpush3.xpose.msra.mxu1 %v1333_v54  ;;  %6531 = vmatprep.mubr.msk.f32.mxu1 %vm7182_vm0, %v7181_v0 }
 0x2db   : > { %6539 = vmatprep.subr.mxu1 %v7181_v0 }
 0x2dd   : > { %6532 = vmatmul.mubr.f32.vlgmr.msra.gmra.mxu1 %v1368_v48 }
 0x2de   : > { %6541 = vmatprep.mubr.msk.f32.mxu1 %vm7182_vm0, %v7181_v0 }
 0x38d   : > { %v1374_v61 = vpop.f32.mrf.mxu0 }
 0x38e   : > { %v1375_v3 = vadd.f32 %v1374_v61, %v7620_v63 }
 0x38f   : > { %v6508_v62 = vpop.f32.mrf.mxu0 }
 0x391   : > { %v1524_v1 = vpop.f32.mrf.mxu0 }
 0x393   : > { %v6518_v2 = vpop.f32.mrf.mxu0 }
 0x395   : > { %v1450_v4 = vpop.f32.mrf.mxu1  ;;  %v1672_v5 = vpop.f32.mrf.mxu0 }
 0x396   : > { %v1451_v6 = vadd.f32 %v1450_v4, %v1375_v3 }
 0x397   : > { %v6513_v7 = vpop.f32.mrf.mxu1  ;;  %v6528_v8 = vpop.f32.mrf.mxu0 }
 0x398   : > { %v1525_v9 = vadd.f32 %v1524_v1, %v1451_v6 }
 0x399   : > { %v1598_v10 = vpop.f32.mrf.mxu1 }
 0x39a   : > { %v1599_v11 = vadd.f32 %v1598_v10, %v1525_v9 }
 0x39b   : > { %v6523_v12 = vpop.f32.mrf.mxu1 }
 0x39c   : > { %v1673_v13 = vadd.f32 %v1672_v5, %v1599_v11 }
 0x39d   : > { %v1744_v14 = vpop.f32.mrf.mxu1 }
 0x39e   : > { %v1745_v15 = vadd.f32 %v1744_v14, %v1673_v13 }
 0x39f   : > { %v6533_v16 = vpop.f32.mrf.mxu1 }
 0x3a0   : > { %v1748_v17 = vsel %vm1297_vm2, %v1745_v15, -inf }
 0x3a1   : > { %1749 = vmax.xlane.f32.xlu1 %v1748_v17 }
 0x3b2   : > { %2213 = vrot.lane.b32.xlu1 %v7593_v46, %s7184_s13 }
 0x3b6   : > { %2211 = vrot.lane.b32.xlu1 %v7593_v46, %s7185_s28 }
 0x42a   : > { %v1750_v18 = vpop.xlane.xlu1 %1749 }
 0x42b   : > { %v1751_v19 = vsub.f32 %v1745_v15, %v1750_v18 }
 0x42d   : > { %v1752_v21 = vmul.f32 1.442695, %v1751_v19 }
 0x42e   : > { %v2214_v26 = vpop.permute.xlu1 %2213 }
 0x42f   : > { %6968 = vpow2.f32 %v1752_v21  ;;  %v2217_v29 = vsel %vm1297_vm2, %v2214_v26, 0 }
 0x430   : > { %v2250_v31 = vand.u32 4294901760, %v2217_v29 }
 0x432   : > { %v2327_v35 = vsub.f32 %v2217_v29, %v2250_v31  ;;  %v2212_v37 = vpop.permute.xlu1 %2211 }
 0x433   : > { %v2215_v41 = vsel %vm1297_vm2, %v2212_v37, 0 }
 0x434   : > { %v2328_v40 = vand.u32 4294901760, %v2327_v35  ;;  %v2285_v43 = vand.u32 4294901760, %v2215_v41 }
 0x436   : > { %v2329_v45 = vsub.f32 %v2327_v35, %v2328_v40  ;;  %v2286_v48 = vsub.f32 %v2215_v41, %v2285_v43 }
 0x438   : > { %v2330_v50 = vand.u32 4294901760, %v2329_v45  ;;  %v2287_v51 = vand.u32 4294901760, %v2286_v48 }
 0x43a   : > { %v2288_v52 = vsub.f32 %v2286_v48, %v2287_v51 }
 0x43c   : > { %v6969_v22 = vpop.eup %6968  ;;  %v2289_v53 = vand.u32 4294901760, %v2288_v52 }
 0x43d   : > { %v1754_v23 = vsel %vm1297_vm2, %v6969_v22, 0.0 }
 0x43e   : > { %1755 = vadd.xlane.f32.xlu0 %v1754_v23 }
 0x454   : > { %1759 = vrot.lane.b32.xlu0 %v7593_v46, %s7186_s24  ;;  %s6023_s24 = scalar_lea.hbm %s8037_s4, %s6153_s6 }
 0x4c7   : > { %v1756_v24 = vpop.xlane.xlu0 %1755 }
 0x4c8   : > { %6970 = vrcp.f32 %v1756_v24 }
 0x4cb   : > { %v1760_v25 = vpop.permute.xlu0 %1759 }
 0x4cc   : > { %v1796_v27 = vand.u32 4294901760, %v1760_v25 }
 0x4ce   : > { %v1873_v28 = vsub.f32 %v1760_v25, %v1796_v27  ;;  %6535 = vmatpush3.msra.mxu0 %v1796_v27 }
 0x4cf   : > { %6544 = vmatprep.subr.mxu0 %v7181_v0 }
 0x4d0   : > { %v1874_v30 = vand.u32 4294901760, %v1873_v28 }
 0x4d2   : > { %v1875_v32 = vsub.f32 %v1873_v28, %v1874_v30 }
 0x4d4   : > { %v1876_v33 = vand.u32 4294901760, %v1875_v32 }
 0x4d5   : > { %v6971_v34 = vpop.eup %6970 }
 0x4d6   : > { %6540 = vmatpush3.msra.mxu1 %v1876_v33  ;;  %v1758_v36 = vmul.f32 %v6971_v34, %v6969_v22 }
 0x4d7   : > { %6549 = vmatprep.subr.mxu1 %v7181_v0 }
 0x4d8   : > { %v1763_v38 = vsel %vm1297_vm2, %v1758_v36, 0 }
 0x4d9   : > { %v1831_v39 = vand.u32 4294901760, %v1763_v38 }
 0x4db   : > { %v1832_v42 = vsub.f32 %v1763_v38, %v1831_v39  ;;  %6542 = vmatmul.mubr.f32.vlgmr.msra.gmra.mxu1 %v1831_v39 }
 0x4dc   : > { %6550 = vmatpush3.msra.mxu1 %v1796_v27  ;;  %6551 = vmatprep.mubr.msk.f32.mxu1 %vm7182_vm0, %v7181_v0 }
 0x4dd   : > { %6559 = vmatprep.subr.mxu1 %v7181_v0  ;;  %v1833_v44 = vand.u32 4294901760, %v1832_v42 }
 0x4df   : > { %6552 = vmatmul.mubr.f32.vlgmr.msra.gmra.mxu1 %v1833_v44  ;;  %v1834_v47 = vsub.f32 %v1832_v42, %v1833_v44 }
 0x4e0   : > { %6560 = vmatpush3.msra.mxu1 %v1796_v27  ;;  %6561 = vmatprep.mubr.msk.f32.mxu1 %vm7182_vm0, %v7181_v0 }
 0x4e1   : > { %6569 = vmatprep.subr.mxu1 %v7181_v0  ;;  %v1835_v49 = vand.u32 4294901760, %v1834_v47 }
 0x4e3   : > { %6537 = vmatmul.mubr.f32.vlgmr.msra.gmra.mxu0 %v1835_v49  ;;  %6562 = vmatmul.mubr.f32.vlgmr.msra.gmra.mxu1 %v1831_v39 }
 0x4e4   : > { %6545 = vmatpush3.msra.mxu0 %v1873_v28  ;;  %6570 = vmatpush3.xpose.msra.mxu1 %v2330_v50 }
 0x4e5   : > { %6546 = vmatprep.mubr.msk.f32.mxu0 %vm7182_vm0, %v7181_v0  ;;  %6554 = vmatprep.subr.mxu0 %v7181_v0 }
 0x4e6   : > { %6571 = vmatprep.mubr.msk.f32.mxu1 %vm7182_vm0, %v7181_v0  ;;  %6579 = vmatprep.subr.mxu1 %v7181_v0 }
 0x4e7   : > { %6547 = vmatmul.mubr.f32.vlgmr.msra.gmra.mxu0 %v1832_v42  ;;  %6572 = vmatmul.mubr.f32.vlgmr.msra.gmra.mxu1 %v2285_v43 }
 0x4e8   : > { %6555 = vmatpush3.msra.mxu0 %v1874_v30  ;;  %6580 = vmatpush3.xpose.msra.mxu1 %v2250_v31 }
 0x4e9   : > { %6556 = vmatprep.mubr.msk.f32.mxu0 %vm7182_vm0, %v7181_v0  ;;  %6564 = vmatprep.subr.mxu0 %v7181_v0 }
 0x4ea   : > { %6581 = vmatprep.mubr.msk.f32.mxu1 %vm7182_vm0, %v7181_v0  ;;  %6589 = vmatprep.subr.mxu1 %v7181_v0 }
 0x4eb   : > { %6557 = vmatmul.mubr.f32.vlgmr.msra.gmra.mxu0 %v1831_v39  ;;  %6582 = vmatmul.mubr.f32.vlgmr.msra.gmra.mxu1 %v2287_v51 }
 0x4ec   : > { %6565 = vmatpush3.xpose.msra.mxu0 %v2250_v31  ;;  %6590 = vmatpush3.xpose.msra.mxu1 %v2250_v31 }
 0x4ed   : > { %6566 = vmatprep.mubr.msk.f32.mxu0 %vm7182_vm0, %v7181_v0  ;;  %6574 = vmatprep.subr.mxu0 %v7181_v0 }
 0x4ee   : > { %6591 = vmatprep.mubr.msk.f32.mxu1 %vm7182_vm0, %v7181_v0  ;;  %6599 = vmatprep.subr.mxu1 %v7181_v0 }
 0x4ef   : > { %6567 = vmatmul.mubr.f32.vlgmr.msra.gmra.mxu0 %v2289_v53  ;;  %6592 = vmatmul.mubr.f32.vlgmr.msra.gmra.mxu1 %v2285_v43 }
 0x4f0   : > { %6575 = vmatpush3.xpose.msra.mxu0 %v2327_v35  ;;  %6576 = vmatprep.mubr.msk.f32.mxu0 %vm7182_vm0, %v7181_v0 }
 0x4f1   : > { %6584 = vmatprep.subr.mxu0 %v7181_v0  ;;  %6601 = vmatprep.mubr.msk.f32.mxu1 %vm7182_vm0, %v7181_v0 }
 0x4f3   : > { %6577 = vmatmul.mubr.f32.vlgmr.msra.gmra.mxu0 %v2286_v48 }
 0x4f4   : > { %6585 = vmatpush3.xpose.msra.mxu0 %v2328_v40  ;;  %6586 = vmatprep.mubr.msk.f32.mxu0 %vm7182_vm0, %v7181_v0 }
 0x4f5   : > { %6594 = vmatprep.subr.mxu0 %v7181_v0 }
 0x4f7   : > { %6587 = vmatmul.mubr.f32.vlgmr.msra.gmra.mxu0 %v2285_v43 }
 0x4f8   : > { %6596 = vmatprep.mubr.msk.f32.mxu0 %vm7182_vm0, %v7181_v0 }
 0x59b   : > { %v1913_v54 = vpop.f32.mrf.mxu1 }
 0x59d   : > { %v6543_v55 = vpop.f32.mrf.mxu1 }
 0x59f   : > { %v2061_v56 = vpop.f32.mrf.mxu1 }
 0x5a1   : > { %v6553_v58 = vpop.f32.mrf.mxu1 }
 0x5a3   : > { %v1837_v59 = vpop.f32.mrf.mxu0  ;;  %v2207_v60 = vpop.f32.mrf.mxu1 }
 0x5a4   : > { %v1914_v61 = vadd.f32 %v1913_v54, %v1837_v59 }
 0x5a5   : > { %v6538_v62 = vpop.f32.mrf.mxu0  ;;  %v6563_v1 = vpop.f32.mrf.mxu1 }
 0x5a7   : > { %v1987_v2 = vpop.f32.mrf.mxu0  ;;  %v2367_v3 = vpop.f32.mrf.mxu1 }
 0x5a8   : > { %v1988_v4 = vadd.f32 %v1987_v2, %v1914_v61 }
 0x5a9   : > { %v6548_v5 = vpop.f32.mrf.mxu0  ;;  %v6573_v6 = vpop.f32.mrf.mxu1 }
 0x5aa   : > { %v2062_v7 = vadd.f32 %v2061_v56, %v1988_v4 }
 0x5ab   : > { %v2135_v8 = vpop.f32.mrf.mxu0  ;;  %v2515_v9 = vpop.f32.mrf.mxu1 }
 0x5ac   : > { %v2136_v10 = vadd.f32 %v2135_v8, %v2062_v7 }
 0x5ad   : > { %v6558_v11 = vpop.f32.mrf.mxu0  ;;  %v6583_v12 = vpop.f32.mrf.mxu1 }
 0x5ae   : > { %v7667_v13 = vadd.f32 %v2207_v60, %v2136_v10 }
 0x5af   : > { %v2291_v14 = vpop.f32.mrf.mxu0  ;;  %v2661_v15 = vpop.f32.mrf.mxu1 }
 0x5b0   : > { %v2292_v16 = vadd.f32 %v2291_v14, %v7620_v63 }
 0x5b1   : > { %v6568_v17 = vpop.f32.mrf.mxu0  ;;  %v6593_v18 = vpop.f32.mrf.mxu1 }
 0x5b2   : > { %v2368_v19 = vadd.f32 %v2367_v3, %v2292_v16 }
 0x5b3   : > { %v2441_v21 = vpop.f32.mrf.mxu0 }
 0x5b4   : > { %v2442_v22 = vadd.f32 %v2441_v21, %v2368_v19 }
 0x5b5   : > { %v6578_v23 = vpop.f32.mrf.mxu0 }
 0x5b6   : > { %v2516_v24 = vadd.f32 %v2515_v9, %v2442_v22 }
 0x5b7   : > { %v2589_v25 = vpop.f32.mrf.mxu0 }
 0x5b8   : > { %v2590_v26 = vadd.f32 %v2589_v25, %v2516_v24 }
 0x5b9   : > { %v6588_v27 = vpop.f32.mrf.mxu0 }
 0x5ba   : > { %v2662_v28 = vadd.f32 %v2661_v15, %v2590_v26 }
 0x5bc   : > { %v2665_v29 = vsel %vm1297_vm2, %v2662_v28, -inf }
 0x5bd   : > { %2666 = vmax.xlane.f32.xlu0 %v2665_v29 }
 0x5d3   : > { %2676 = vrot.lane.b32.xlu0 %v7593_v46, %s7187_s26  ;;  %s6012_s26 = scalar_lea.sflag [#allocation4], %s7383_s12 }
 0x5d7   : > { %3128 = vrot.lane.b32.xlu0 %v7593_v46, %s7188_s8 }
 0x646   : > { %v2667_v30 = vpop.xlane.xlu0 %2666 }
 0x647   : > { %v2668_v31 = vsub.f32 %v2662_v28, %v2667_v30 }
 0x649   : > { %v2669_v32 = vmul.f32 1.442695, %v2668_v31 }
 0x64a   : > { %v2677_v33 = vpop.permute.xlu0 %2676 }
 0x64b   : > { %6972 = vpow2.f32 %v2669_v32  ;;  %v2713_v34 = vand.u32 4294901760, %v2677_v33 }
 0x64d   : > { %v2790_v35 = vsub.f32 %v2677_v33, %v2713_v34  ;;  %6595 = vmatpush3.msra.mxu0 %v2713_v34 }
 0x64e   : > { %6604 = vmatprep.subr.mxu0 %v7181_v0  ;;  %v3129_v49 = vpop.permute.xlu0 %3128 }
 0x64f   : > { %v2791_v36 = vand.u32 4294901760, %v2790_v35  ;;  %v3132_v52 = vsel %vm1297_vm2, %v3129_v49, 0 }
 0x650   : > { %v3202_v55 = vand.u32 4294901760, %v3132_v52 }
 0x651   : > { %v2792_v37 = vsub.f32 %v2790_v35, %v2791_v36 }
 0x652   : > { %v3203_v60 = vsub.f32 %v3132_v52, %v3202_v55 }
 0x653   : > { %v2793_v38 = vand.u32 4294901760, %v2792_v37 }
 0x654   : > { %v3204_v1 = vand.u32 4294901760, %v3203_v60 }
 0x655   : > { %6600 = vmatpush3.msra.mxu1 %v2793_v38 }
 0x656   : > { %6609 = vmatprep.subr.mxu1 %v7181_v0  ;;  %v3205_v2 = vsub.f32 %v3203_v60, %v3204_v1 }
 0x658   : > { %v6973_v39 = vpop.eup %6972  ;;  %v3206_v3 = vand.u32 4294901760, %v3205_v2 }
 0x659   : > { %v2671_v40 = vsel %vm1297_vm2, %v6973_v39, 0.0 }
 0x65a   : > { %2672 = vadd.xlane.f32.xlu1 %v2671_v40 }
 0x66b   : > { %3130 = vrot.lane.b32.xlu1 %v7593_v46, %s7189_s27  ;;  %s7197_s27 = smov [#allocation10]  }
 0x6e3   : > { %v2673_v41 = vpop.xlane.xlu1 %2672 }
 0x6e4   : > { %6974 = vrcp.f32 %v2673_v41 }
 0x6e7   : > { %v3131_v42 = vpop.permute.xlu1 %3130 }
 0x6e8   : > { %v3134_v43 = vsel %vm1297_vm2, %v3131_v42, 0 }
 0x6e9   : > { %v3167_v44 = vand.u32 4294901760, %v3134_v43 }
 0x6eb   : > { %v3244_v47 = vsub.f32 %v3134_v43, %v3167_v44 }
 0x6ed   : > { %v3245_v53 = vand.u32 4294901760, %v3244_v47 }
 0x6ef   : > { %v3246_v58 = vsub.f32 %v3244_v47, %v3245_v53 }
 0x6f1   : > { %v6975_v45 = vpop.eup %6974  ;;  %v3247_v62 = vand.u32 4294901760, %v3246_v58 }
 0x6f2   : > { %v2675_v48 = vmul.f32 %v6975_v45, %v6973_v39 }
 0x6f4   : > { %v2680_v50 = vsel %vm1297_vm2, %v2675_v48, 0 }
 0x6f5   : > { %v2748_v51 = vand.u32 4294901760, %v2680_v50 }
 0x6f7   : > { %v2749_v54 = vsub.f32 %v2680_v50, %v2748_v51  ;;  %6602 = vmatmul.mubr.f32.vlgmr.msra.gmra.mxu1 %v2748_v51 }
 0x6f8   : > { %6610 = vmatpush3.msra.mxu1 %v2713_v34  ;;  %6611 = vmatprep.mubr.msk.f32.mxu1 %vm7182_vm0, %v7181_v0 }
 0x6f9   : > { %6619 = vmatprep.subr.mxu1 %v7181_v0  ;;  %v2750_v56 = vand.u32 4294901760, %v2749_v54 }
 0x6fb   : > { %6612 = vmatmul.mubr.f32.vlgmr.msra.gmra.mxu1 %v2750_v56  ;;  %v2751_v59 = vsub.f32 %v2749_v54, %v2750_v56 }
 0x6fc   : > { %6620 = vmatpush3.msra.mxu1 %v2713_v34  ;;  %6621 = vmatprep.mubr.msk.f32.mxu1 %vm7182_vm0, %v7181_v0 }
 0x6fd   : > { %6629 = vmatprep.subr.mxu1 %v7181_v0  ;;  %v2752_v61 = vand.u32 4294901760, %v2751_v59 }
 0x6ff   : > { %6597 = vmatmul.mubr.f32.vlgmr.msra.gmra.mxu0 %v2752_v61  ;;  %6622 = vmatmul.mubr.f32.vlgmr.msra.gmra.mxu1 %v2748_v51 }
 0x700   : > { %6605 = vmatpush3.msra.mxu0 %v2790_v35  ;;  %6630 = vmatpush3.xpose.msra.mxu1 %v3247_v62 }
 0x701   : > { %6606 = vmatprep.mubr.msk.f32.mxu0 %vm7182_vm0, %v7181_v0  ;;  %6614 = vmatprep.subr.mxu0 %v7181_v0 }
 0x702   : > { %6631 = vmatprep.mubr.msk.f32.mxu1 %vm7182_vm0, %v7181_v0  ;;  %6639 = vmatprep.subr.mxu1 %v7181_v0 }
 0x703   : > { %6607 = vmatmul.mubr.f32.vlgmr.msra.gmra.mxu0 %v2749_v54  ;;  %6632 = vmatmul.mubr.f32.vlgmr.msra.gmra.mxu1 %v3202_v55 }
 0x704   : > { %6615 = vmatpush3.msra.mxu0 %v2791_v36  ;;  %6640 = vmatpush3.xpose.msra.mxu1 %v3167_v44 }
 0x705   : > { %6616 = vmatprep.mubr.msk.f32.mxu0 %vm7182_vm0, %v7181_v0  ;;  %6624 = vmatprep.subr.mxu0 %v7181_v0 }
 0x706   : > { %6641 = vmatprep.mubr.msk.f32.mxu1 %vm7182_vm0, %v7181_v0  ;;  %6649 = vmatprep.subr.mxu1 %v7181_v0 }
 0x707   : > { %6617 = vmatmul.mubr.f32.vlgmr.msra.gmra.mxu0 %v2748_v51  ;;  %6642 = vmatmul.mubr.f32.vlgmr.msra.gmra.mxu1 %v3204_v1 }
 0x708   : > { %6625 = vmatpush3.xpose.msra.mxu0 %v3167_v44  ;;  %6650 = vmatpush3.xpose.msra.mxu1 %v3167_v44 }
 0x709   : > { %6626 = vmatprep.mubr.msk.f32.mxu0 %vm7182_vm0, %v7181_v0  ;;  %6634 = vmatprep.subr.mxu0 %v7181_v0 }
 0x70a   : > { %6651 = vmatprep.mubr.msk.f32.mxu1 %vm7182_vm0, %v7181_v0  ;;  %6659 = vmatprep.subr.mxu1 %v7181_v0 }
 0x70b   : > { %6627 = vmatmul.mubr.f32.vlgmr.msra.gmra.mxu0 %v3206_v3  ;;  %6652 = vmatmul.mubr.f32.vlgmr.msra.gmra.mxu1 %v3202_v55 }
 0x70c   : > { %6635 = vmatpush3.xpose.msra.mxu0 %v3244_v47  ;;  %6636 = vmatprep.mubr.msk.f32.mxu0 %vm7182_vm0, %v7181_v0 }
 0x70d   : > { %6644 = vmatprep.subr.mxu0 %v7181_v0  ;;  %6661 = vmatprep.mubr.msk.f32.mxu1 %vm7182_vm0, %v7181_v0 }
 0x70f   : > { %6637 = vmatmul.mubr.f32.vlgmr.msra.gmra.mxu0 %v3203_v60 }
 0x710   : > { %6645 = vmatpush3.xpose.msra.mxu0 %v3245_v53  ;;  %6646 = vmatprep.mubr.msk.f32.mxu0 %vm7182_vm0, %v7181_v0 }
 0x711   : > { %6654 = vmatprep.subr.mxu0 %v7181_v0 }
 0x713   : > { %6647 = vmatmul.mubr.f32.vlgmr.msra.gmra.mxu0 %v3202_v55 }
 0x714   : > { %6656 = vmatprep.mubr.msk.f32.mxu0 %vm7182_vm0, %v7181_v0 }
 0x7b7   : > { %v2830_v4 = vpop.f32.mrf.mxu1 }
 0x7b9   : > { %v6603_v5 = vpop.f32.mrf.mxu1 }
 0x7bb   : > { %v2978_v6 = vpop.f32.mrf.mxu1 }
 0x7bd   : > { %v6613_v7 = vpop.f32.mrf.mxu1 }
 0x7bf   : > { %v2754_v8 = vpop.f32.mrf.mxu0  ;;  %v3124_v9 = vpop.f32.mrf.mxu1 }
 0x7c0   : > { %v2831_v10 = vadd.f32 %v2830_v4, %v2754_v8 }
 0x7c1   : > { %v6598_v11 = vpop.f32.mrf.mxu0  ;;  %v6623_v12 = vpop.f32.mrf.mxu1 }
 0x7c3   : > { %v2904_v14 = vpop.f32.mrf.mxu0  ;;  %v3284_v15 = vpop.f32.mrf.mxu1 }
 0x7c4   : > { %v2905_v16 = vadd.f32 %v2904_v14, %v2831_v10 }
 0x7c5   : > { %v6608_v17 = vpop.f32.mrf.mxu0  ;;  %v6633_v18 = vpop.f32.mrf.mxu1 }
 0x7c6   : > { %v2979_v19 = vadd.f32 %v2978_v6, %v2905_v16 }
 0x7c7   : > { %v3052_v21 = vpop.f32.mrf.mxu0  ;;  %v3432_v22 = vpop.f32.mrf.mxu1 }
 0x7c8   : > { %v3053_v23 = vadd.f32 %v3052_v21, %v2979_v19 }
 0x7c9   : > { %v6618_v24 = vpop.f32.mrf.mxu0  ;;  %v6643_v25 = vpop.f32.mrf.mxu1 }
 0x7ca   : > { %v7714_v26 = vadd.f32 %v3124_v9, %v3053_v23 }
 0x7cb   : > { %v3208_v27 = vpop.f32.mrf.mxu0  ;;  %v3578_v28 = vpop.f32.mrf.mxu1 }
 0x7cc   : > { %v3209_v29 = vadd.f32 %v3208_v27, %v7620_v63 }
 0x7cd   : > { %v6628_v30 = vpop.f32.mrf.mxu0  ;;  %v6653_v31 = vpop.f32.mrf.mxu1 }
 0x7ce   : > { %v3285_v32 = vadd.f32 %v3284_v15, %v3209_v29 }
 0x7cf   : > { %v3358_v33 = vpop.f32.mrf.mxu0 }
 0x7d0   : > { %v3359_v34 = vadd.f32 %v3358_v33, %v3285_v32 }
 0x7d1   : > { %v6638_v35 = vpop.f32.mrf.mxu0 }
 0x7d2   : > { %v3433_v36 = vadd.f32 %v3432_v22, %v3359_v34 }
 0x7d3   : > { %v3506_v37 = vpop.f32.mrf.mxu0 }
 0x7d4   : > { %v3507_v38 = vadd.f32 %v3506_v37, %v3433_v36 }
 0x7d5   : > { %v6648_v39 = vpop.f32.mrf.mxu0 }
 0x7d6   : > { %v3579_v40 = vadd.f32 %v3578_v28, %v3507_v38 }
 0x7d8   : > { %v3582_v41 = vsel %vm1297_vm2, %v3579_v40, -inf }
 0x7d9   : > { %3583 = vmax.xlane.f32.xlu1 %v3582_v41 }
 0x7ea   : > { %4047 = vrot.lane.b32.xlu1 %v7593_v46, %s7190_s25  ;;  %s7101_s25 = sshll.u32 %s7197_s27, 4  ;;  %s7102_s25 = int_to_ptr.vmem [resolvable:$false] %s7101_s25 }
 0x7eb   : > { %s7103_s19 = scalar_lea.vmem %s7102_s25, 256 }
 0x7ee   : > { %4045 = vrot.lane.b32.xlu1 %v7593_v46, %s7191_s29 }
 0x862   : > { %v3584_v42 = vpop.xlane.xlu1 %3583 }
 0x863   : > { %v3585_v43 = vsub.f32 %v3579_v40, %v3584_v42 }
 0x865   : > { %v3586_v44 = vmul.f32 1.442695, %v3585_v43 }
 0x866   : > { %v4048_v50 = vpop.permute.xlu1 %4047 }
 0x867   : > { %6976 = vpow2.f32 %v3586_v44  ;;  %v4051_v53 = vsel %vm1297_vm2, %v4048_v50, 0 }
 0x868   : > { %v4084_v55 = vand.u32 4294901760, %v4051_v53 }
 0x86a   : > { %v4161_v60 = vsub.f32 %v4051_v53, %v4084_v55  ;;  %v4046_v62 = vpop.permute.xlu1 %4045 }
 0x86b   : > { %v4049_v4 = vsel %vm1297_vm2, %v4046_v62, 0 }
 0x86c   : > { %v4162_v3 = vand.u32 4294901760, %v4161_v60  ;;  %v4119_v6 = vand.u32 4294901760, %v4049_v4 }
 0x86e   : > { %v4163_v8 = vsub.f32 %v4161_v60, %v4162_v3  ;;  %v4120_v10 = vsub.f32 %v4049_v4, %v4119_v6 }
 0x870   : > { %v4164_v12 = vand.u32 4294901760, %v4163_v8  ;;  %v4121_v14 = vand.u32 4294901760, %v4120_v10 }
 0x872   : > { %v4122_v15 = vsub.f32 %v4120_v10, %v4121_v14 }
 0x874   : > { %v6977_v45 = vpop.eup %6976  ;;  %v4123_v16 = vand.u32 4294901760, %v4122_v15 }
 0x875   : > { %v3588_v47 = vsel %vm1297_vm2, %v6977_v45, 0.0 }
 0x876   : > { %3589 = vadd.xlane.f32.xlu0 %v3588_v47 }
 0x88c   : > { %3593 = vrot.lane.b32.xlu0 %v7593_v46, %s7192_s5 }
 0x8ff   : > { %v3590_v48 = vpop.xlane.xlu0 %3589 }
 0x900   : > { %6978 = vrcp.f32 %v3590_v48 }
 0x903   : > { %v3594_v49 = vpop.permute.xlu0 %3593 }
 0x904   : > { %v3630_v51 = vand.u32 4294901760, %v3594_v49 }
 0x906   : > { %v3707_v52 = vsub.f32 %v3594_v49, %v3630_v51  ;;  %6655 = vmatpush3.msra.mxu0 %v3630_v51 }
 0x907   : > { %6664 = vmatprep.subr.mxu0 %v7181_v0 }
 0x908   : > { %v3708_v54 = vand.u32 4294901760, %v3707_v52 }
 0x90a   : > { %v3709_v56 = vsub.f32 %v3707_v52, %v3708_v54 }
 0x90c   : > { %v3710_v58 = vand.u32 4294901760, %v3709_v56 }
 0x90d   : > { %v6979_v59 = vpop.eup %6978 }
 0x90e   : > { %6660 = vmatpush3.msra.mxu1 %v3710_v58  ;;  %v3592_v61 = vmul.f32 %v6979_v59, %v6977_v45 }
 0x90f   : > { %6669 = vmatprep.subr.mxu1 %v7181_v0 }
 0x910   : > { %v3597_v1 = vsel %vm1297_vm2, %v3592_v61, 0 }
 0x911   : > { %v3665_v2 = vand.u32 4294901760, %v3597_v1 }
 0x913   : > { %v3666_v5 = vsub.f32 %v3597_v1, %v3665_v2  ;;  %6662 = vmatmul.mubr.f32.vlgmr.msra.gmra.mxu1 %v3665_v2 }
 0x914   : > { %6670 = vmatpush3.msra.mxu1 %v3630_v51  ;;  %6671 = vmatprep.mubr.msk.f32.mxu1 %vm7182_vm0, %v7181_v0 }
 0x915   : > { %6679 = vmatprep.subr.mxu1 %v7181_v0  ;;  %v3667_v7 = vand.u32 4294901760, %v3666_v5 }
 0x917   : > { %6672 = vmatmul.mubr.f32.vlgmr.msra.gmra.mxu1 %v3667_v7  ;;  %v3668_v9 = vsub.f32 %v3666_v5, %v3667_v7 }
 0x918   : > { %6680 = vmatpush3.msra.mxu1 %v3630_v51  ;;  %6681 = vmatprep.mubr.msk.f32.mxu1 %vm7182_vm0, %v7181_v0 }
 0x919   : > { %6689 = vmatprep.subr.mxu1 %v7181_v0  ;;  %v3669_v11 = vand.u32 4294901760, %v3668_v9 }
 0x91b   : > { %6657 = vmatmul.mubr.f32.vlgmr.msra.gmra.mxu0 %v3669_v11  ;;  %6682 = vmatmul.mubr.f32.vlgmr.msra.gmra.mxu1 %v3665_v2 }
 0x91c   : > { %6665 = vmatpush3.msra.mxu0 %v3707_v52  ;;  %6690 = vmatpush3.xpose.msra.mxu1 %v4164_v12  ;;  %v285_v12 = vld [vmem:[#allocation7 + $0x38] sm:$0xff] }
 0x91d   : > { %6666 = vmatprep.mubr.msk.f32.mxu0 %vm7182_vm0, %v7181_v0  ;;  %6674 = vmatprep.subr.mxu0 %v7181_v0  ;;  %v7785_v15 = vand.u32 4294901760, %v285_v12 }
 0x91e   : > { %6691 = vmatprep.mubr.msk.f32.mxu1 %vm7182_vm0, %v7181_v0  ;;  %6699 = vmatprep.subr.mxu1 %v7181_v0 }
 0x91f   : > { %6667 = vmatmul.mubr.f32.vlgmr.msra.gmra.mxu0 %v3666_v5  ;;  %6692 = vmatmul.mubr.f32.vlgmr.msra.gmra.mxu1 %v4119_v6 }
 0x920   : > { %6675 = vmatpush3.msra.mxu0 %v3708_v54  ;;  %6700 = vmatpush3.xpose.msra.mxu1 %v4084_v55 }
 0x921   : > { %6676 = vmatprep.mubr.msk.f32.mxu0 %vm7182_vm0, %v7181_v0  ;;  %6684 = vmatprep.subr.mxu0 %v7181_v0 }
 0x922   : > { %6701 = vmatprep.mubr.msk.f32.mxu1 %vm7182_vm0, %v7181_v0  ;;  %6709 = vmatprep.subr.mxu1 %v7181_v0 }
 0x923   : > { %6677 = vmatmul.mubr.f32.vlgmr.msra.gmra.mxu0 %v3665_v2  ;;  %6702 = vmatmul.mubr.f32.vlgmr.msra.gmra.mxu1 %v4121_v14  ;;  %v283_v14 = vld [vmem:[#allocation7 + $0x28] sm:$0xff] }
 0x924   : > { %6685 = vmatpush3.xpose.msra.mxu0 %v4084_v55  ;;  %6710 = vmatpush3.xpose.msra.mxu1 %v4084_v55 }
 0x925   : > { %6686 = vmatprep.mubr.msk.f32.mxu0 %vm7182_vm0, %v7181_v0  ;;  %6694 = vmatprep.subr.mxu0 %v7181_v0 }
 0x926   : > { %6711 = vmatprep.mubr.msk.f32.mxu1 %vm7182_vm0, %v7181_v0  ;;  %6719 = vmatprep.subr.mxu1 %v7181_v0 }
 0x927   : > { %6687 = vmatmul.mubr.f32.vlgmr.msra.gmra.mxu0 %v4123_v16  ;;  %6712 = vmatmul.mubr.f32.vlgmr.msra.gmra.mxu1 %v4119_v6  ;;  %v7787_v16 = vand.u32 4294901760, %v283_v14 }
 0x928   : > { %6695 = vmatpush3.xpose.msra.mxu0 %v4161_v60  ;;  %6696 = vmatprep.mubr.msk.f32.mxu0 %vm7182_vm0, %v7181_v0 }
 0x929   : > { %6704 = vmatprep.subr.mxu0 %v7181_v0  ;;  %6721 = vmatprep.mubr.msk.f32.mxu1 %vm7182_vm0, %v7181_v0 }
 0x92b   : > { %6697 = vmatmul.mubr.f32.vlgmr.msra.gmra.mxu0 %v4120_v10 }
 0x92c   : > { %6705 = vmatpush3.xpose.msra.mxu0 %v4162_v3  ;;  %6706 = vmatprep.mubr.msk.f32.mxu0 %vm7182_vm0, %v7181_v0 }
 0x92d   : > { %6714 = vmatprep.subr.mxu0 %v7181_v0 }
 0x92f   : > { %6707 = vmatmul.mubr.f32.vlgmr.msra.gmra.mxu0 %v4119_v6 }
 0x930   : > { %6716 = vmatprep.mubr.msk.f32.mxu0 %vm7182_vm0, %v7181_v0 }
 0x9d3   : > { %v3747_v17 = vpop.f32.mrf.mxu1 }
 0x9d5   : > { %v6663_v18 = vpop.f32.mrf.mxu1 }
 0x9d6   : > { %v7794_v18 = vsub.f32 %v283_v14, %v7787_v16 }
 0x9d7   : > { %v3895_v19 = vpop.f32.mrf.mxu1 }
 0x9d9   : > { %v6673_v21 = vpop.f32.mrf.mxu1 }
 0x9da   : > { %v5099_v21 = vand.u32 4294901760, %v7794_v18 }
 0x9db   : > { %v3671_v22 = vpop.f32.mrf.mxu0  ;;  %v4041_v23 = vpop.f32.mrf.mxu1 }
 0x9dc   : > { %v3748_v51 = vadd.f32 %v3747_v17, %v3671_v22  ;;  %v7791_v17 = vsub.f32 %v285_v12, %v7785_v15 }
 0x9dd   : > { %v6658_v24 = vpop.f32.mrf.mxu0  ;;  %v6683_v25 = vpop.f32.mrf.mxu1 }
 0x9df   : > { %v3821_v27 = vpop.f32.mrf.mxu0  ;;  %v4201_v28 = vpop.f32.mrf.mxu1 }
 0x9e0   : > { %v3822_v52 = vadd.f32 %v3821_v27, %v3748_v51  ;;  %v281_v27 = vld [vmem:[#allocation7 + $0x18] sm:$0xff] }
 0x9e1   : > { %v6668_v29 = vpop.f32.mrf.mxu0  ;;  %v6693_v30 = vpop.f32.mrf.mxu1 }
 0x9e2   : > { %v3896_v53 = vadd.f32 %v3895_v19, %v3822_v52  ;;  %v5092_v19 = vand.u32 4294901760, %v7791_v17  ;;  %v279_v30 = vld [vmem:[#allocation7 + $0x8] sm:$0xff] }
 0x9e3   : > { %v3969_v31 = vpop.f32.mrf.mxu0  ;;  %v4349_v32 = vpop.f32.mrf.mxu1 }
 0x9e4   : > { %v3970_v54 = vadd.f32 %v3969_v31, %v3896_v53  ;;  %v5093_v22 = vsub.f32 %v7791_v17, %v5092_v19 }
 0x9e5   : > { %v6678_v33 = vpop.f32.mrf.mxu0  ;;  %v6703_v34 = vpop.f32.mrf.mxu1 }
 0x9e6   : > { %v5094_v24 = vand.u32 4294901760, %v5093_v22 }
 0x9e7   : > { %v4125_v35 = vpop.f32.mrf.mxu0  ;;  %v4495_v36 = vpop.f32.mrf.mxu1 }
 0x9e8   : > { %v4126_v37 = vadd.f32 %v4125_v35, %v7620_v63  ;;  %v4042_v63 = vadd.f32 %v4041_v23, %v3970_v54  ;;  %v5100_v23 = vsub.f32 %v7794_v18, %v5099_v21 }
 0x9e9   : > { %v6688_v38 = vpop.f32.mrf.mxu0  ;;  %v6713_v39 = vpop.f32.mrf.mxu1 }
 0x9ea   : > { %v4202_v40 = vadd.f32 %v4201_v28, %v4126_v37  ;;  %v5101_v25 = vand.u32 4294901760, %v5100_v23  ;;  %v7810_v28 = vand.u32 4294901760, %v281_v27 }
 0x9eb   : > { %v4275_v41 = vpop.f32.mrf.mxu0 }
 0x9ec   : > { %v4276_v42 = vadd.f32 %v4275_v41, %v4202_v40  ;;  %v7814_v31 = vsub.f32 %v281_v27, %v7810_v28 }
 0x9ed   : > { %v6698_v43 = vpop.f32.mrf.mxu0 }
 0x9ee   : > { %v4350_v44 = vadd.f32 %v4349_v32, %v4276_v42  ;;  %v7816_v32 = vand.u32 4294901760, %v279_v30  ;;  %v5106_v34 = vand.u32 4294901760, %v7814_v31 }
 0x9ef   : > { %v4423_v45 = vpop.f32.mrf.mxu0 }
 0x9f0   : > { %v4424_v47 = vadd.f32 %v4423_v45, %v4350_v44  ;;  %v7822_v35 = vsub.f32 %v279_v30, %v7816_v32  ;;  %v5107_v37 = vsub.f32 %v7814_v31, %v5106_v34 }
 0x9f1   : > { %v6708_v48 = vpop.f32.mrf.mxu0 }
 0x9f2   : > { %v4496_v49 = vadd.f32 %v4495_v36, %v4424_v47  ;;  %v5113_v38 = vand.u32 4294901760, %v7822_v35  ;;  %v5108_v40 = vand.u32 4294901760, %v5107_v37  ;;  %v7937_v37 = vld [vmem:[#allocation8] sm:$0xff] }
 0x9f4   : > { %v4499_v50 = vsel %vm1297_vm2, %v4496_v49, -inf  ;;  %v5114_v41 = vsub.f32 %v7822_v35, %v5113_v38 }
 0x9f5   : > { %4500 = vmax.xlane.f32.xlu0 %v4499_v50 }
 0x9f6   : > { %v5115_v44 = vand.u32 4294901760, %v5114_v41 }
 0xa0b   : > { %4510 = vrot.lane.b32.xlu0 %v7593_v46, %s7193_s10 }
 0xa0f   : > { %4967 = vrot.lane.b32.xlu0 %v4042_v63, %s7194_s30 }
 0xa13   : > { %5486 = vrot.lane.b32.xlu0 %v285_v12, %s7183_s21 }
 0xa17   : > { %5482 = vrot.lane.b32.xlu0 %v281_v27, %s7183_s21 }
 0xa7e   : > { %v4501_v55 = vpop.xlane.xlu0 %4500 }
 0xa7f   : > { %v4502_v56 = vsub.f32 %v4496_v49, %v4501_v55 }
 0xa81   : > { %v4503_v58 = vmul.f32 1.442695, %v4502_v56 }
 0xa82   : > { %v4511_v59 = vpop.permute.xlu0 %4510 }
 0xa83   : > { %6980 = vpow2.f32 %v4503_v58  ;;  %v4547_v60 = vand.u32 4294901760, %v4511_v59 }
 0xa85   : > { %v4624_v61 = vsub.f32 %v4511_v59, %v4547_v60  ;;  %6715 = vmatpush3.msra.mxu0 %v4547_v60 }
 0xa86   : > { %6724 = vmatprep.subr.mxu0 %v7181_v0  ;;  %v4968_v59 = vpop.permute.xlu0 %4967 }
 0xa87   : > { %v4625_v62 = vand.u32 4294901760, %v4624_v61 }
 0xa89   : > { %v4626_v1 = vsub.f32 %v4624_v61, %v4625_v62 }
 0xa8b   : > { %v4627_v2 = vand.u32 4294901760, %v4626_v1 }
 0xa8d   : > { %6720 = vmatpush3.msra.mxu1 %v4627_v2 }
 0xa8e   : > { %6729 = vmatprep.subr.mxu1 %v7181_v0 }
 0xa90   : > { %v6981_v46 = vpop.eup %6980 }
 0xa91   : > { %v4505_v3 = vsel %vm1297_vm2, %v6981_v46, 0.0 }
 0xa92   : > { %4506 = vadd.xlane.f32.xlu1 %v4505_v3 }
 0xaa3   : > { %4963 = vrot.lane.b32.xlu1 %v7714_v26, %s7195_s7 }
 0xb1b   : > { %v4507_v4 = vpop.xlane.xlu1 %4506 }
 0xb1c   : > { %6982 = vrcp.f32 %v4507_v4 }
 0xb1f   : > { %v4964_v56 = vpop.permute.xlu1 %4963 }
 0xb20   : > { %v4974_v58 = vsel %vm1297_vm2, %v7667_v13, %v4964_v56 }
 0xb29   : > { %v6983_v5 = vpop.eup %6982 }
 0xb2a   : > { %v4509_v6 = vmul.f32 %v6983_v5, %v6981_v46  ;;  %v5487_v5 = vpop.permute.xlu0 %5486 }
 0xb2c   : > { %v4514_v7 = vsel %vm1297_vm2, %v4509_v6, 0  ;;  %v7888_v6 = vand.u32 4294901760, %v5487_v5 }
 0xb2d   : > { %v4582_v8 = vand.u32 4294901760, %v4514_v7 }
 0xb2e   : > { %v5483_v12 = vpop.permute.xlu0 %5482 }
 0xb2f   : > { %v4583_v9 = vsub.f32 %v4514_v7, %v4582_v8  ;;  %6722 = vmatmul.mubr.f32.vlgmr.msra.gmra.mxu1 %v4582_v8  ;;  %v7891_v7 = vsub.f32 %v5487_v5, %v7888_v6 }
 0xb30   : > { %6730 = vmatpush3.msra.mxu1 %v4547_v60  ;;  %6731 = vmatprep.mubr.msk.f32.mxu1 %vm7182_vm0, %v7181_v0 }
 0xb31   : > { %6739 = vmatprep.subr.mxu1 %v7181_v0  ;;  %v4584_v10 = vand.u32 4294901760, %v4583_v9 }
 0xb33   : > { %6732 = vmatmul.mubr.f32.vlgmr.msra.gmra.mxu1 %v4584_v10  ;;  %v4585_v11 = vsub.f32 %v4583_v9, %v4584_v10 }
 0xb34   : > { %6740 = vmatpush3.msra.mxu1 %v4547_v60  ;;  %6741 = vmatprep.mubr.msk.f32.mxu1 %vm7182_vm0, %v7181_v0  ;;  %v4976_v60 = vsel %vm4975_vm3, %v4974_v58, %v4968_v59 }
 0xb35   : > { %v4586_v26 = vand.u32 4294901760, %v4585_v11  ;;  %6755 = vmatprep.subr.mxu1 %v7181_v0 }
 0xb37   : > { %6717 = vmatmul.mubr.f32.vlgmr.msra.gmra.mxu0 %v4586_v26  ;;  %6742 = vmatmul.mubr.f32.vlgmr.msra.gmra.mxu1 %v4582_v8 }
 0xb38   : > { %6725 = vmatpush3.msra.mxu0 %v4624_v61  ;;  %6726 = vmatprep.mubr.msk.f32.mxu0 %vm7182_vm0, %v7181_v0 }
 0xb39   : > { %6734 = vmatprep.subr.mxu0 %v7181_v0  ;;  %6763 = vmatprep.mubr.msk.f32.mxu1 %vm7182_vm0, %v7181_v0 }
 0xb3a   : > { %6756 = vmatpush3.msra.mxu1 %v5094_v24 }
 0xb3b   : > { %6727 = vmatmul.mubr.f32.vlgmr.msra.gmra.mxu0 %v4583_v9  ;;  %6757 = vmatprep.subr.mxu1 %v7181_v0 }
 0xb3c   : > { %6735 = vmatpush3.msra.mxu0 %v4625_v62  ;;  %6736 = vmatprep.mubr.msk.f32.mxu0 %vm7182_vm0, %v7181_v0 }
 0xb3d   : > { %6744 = vmatprep.subr.mxu0 %v7181_v0  ;;  %6758 = vmatpush3.msra.mxu1 %v5101_v25 }
 0xb3e   : > { %6759 = vmatprep.subr.mxu1 %v7181_v0 }
 0xb3f   : > { %6737 = vmatmul.mubr.f32.vlgmr.msra.gmra.mxu0 %v4582_v8  ;;  %6760 = vmatpush3.msra.mxu1 %v5108_v40  ;;  %v5601_v8 = vand.u32 4294901760, %v7891_v7 }
 0xb40   : > { %6752 = vmatprep.mubr.msk.f32.mxu0 %vm7182_vm0, %v7181_v0  ;;  %6745 = vmatpush3.msra.mxu0 %v7785_v15 }
 0xb41   : > { %6746 = vmatprep.subr.mxu0 %v7181_v0  ;;  %6761 = vmatprep.subr.mxu1 %v7181_v0  ;;  %v5602_v9 = vsub.f32 %v7891_v7, %v5601_v8 }
 0xb42   : > { %6747 = vmatpush3.msra.mxu0 %v7787_v16  ;;  %6762 = vmatpush3.msra.mxu1 %v5115_v44 }
 0xb43   : > { %6748 = vmatprep.subr.mxu0 %v7181_v0  ;;  %6777 = vmatprep.subr.mxu1 %v7181_v0  ;;  %v5603_v26 = vand.u32 4294901760, %v5602_v9 }
 0xb44   : > { %6749 = vmatpush3.msra.mxu0 %v7810_v28 }
 0xb45   : > { %6750 = vmatprep.subr.mxu0 %v7181_v0 }
 0xb46   : > { %6751 = vmatpush3.msra.mxu0 %v7816_v32 }
 0xb47   : > { %6766 = vmatprep.subr.mxu0 %v7181_v0 }
 0xbef   : > { %v4664_v29 = vpop.f32.mrf.mxu1 }
 0xbf1   : > { %v6723_v33 = vpop.f32.mrf.mxu1 }
 0xbf2   : > { %v4981_v33 = vsub.s32 2, %v7533_v57 }
 0xbf3   : > { %v4812_v36 = vpop.f32.mrf.mxu1 }
 0xbf5   : > { %v6733_v39 = vpop.f32.mrf.mxu1 }
 0xbf7   : > { %v4588_v42 = vpop.f32.mrf.mxu0  ;;  %v4958_v43 = vpop.f32.mrf.mxu1 }
 0xbf8   : > { %v4665_v48 = vadd.f32 %v4664_v29, %v4588_v42 }
 0xbf9   : > { %v6718_v45 = vpop.f32.mrf.mxu0  ;;  %v6743_v47 = vpop.f32.mrf.mxu1 }
 0xbfb   : > { %v4738_v49 = vpop.f32.mrf.mxu0 }
 0xbfc   : > { %v4739_v50 = vadd.f32 %v4738_v49, %v4665_v48 }
 0xbfd   : > { %v6728_v51 = vpop.f32.mrf.mxu0 }
 0xbfe   : > { %v4813_v52 = vadd.f32 %v4812_v36, %v4739_v50 }
 0xbff   : > { %v4886_v53 = vpop.f32.mrf.mxu0 }
 0xc00   : > { %v4887_v54 = vadd.f32 %v4886_v53, %v4813_v52 }
 0xc01   : > { %v6738_v63 = vpop.f32.mrf.mxu0 }
 0xc02   : > { %v4959_v55 = vadd.f32 %v4958_v43, %v4887_v54 }
 0xc04   : > { %4971 = vrot.lane.b32.xlu1 %v4959_v55, %s7196_s23 }
 0xc08   : > { %5484 = vrot.lane.b32.xlu1 %v283_v14, %s7183_s21 }
 0xc0c   : > { %5480 = vrot.lane.b32.xlu1 %v279_v30, %s7183_s21  ;;  %s6025_s21 = sshll.u32 %s276_s9, 4  ;;  %s6026_s21 = int_to_ptr.vmem [resolvable:$true] %s6025_s21 }
 0xc0d   : > { %s7097_s8 = scalar_lea.vmem %s6026_s21, 128  ;;  %p7104_p5 = scmp.lt.s32.totalorder %s6026_s21, %s7102_s25 }
 0xc0e   : > { %p7098_p12 = scmp.ne.s32.totalorder %s6026_s21, %s7097_s8  ;;  %p7105_p1 = scmp.lt.s32.totalorder %s7103_s19, %s7097_s8 }
 0xc10   : > { %p7099_p9 = pnand %p7098_p12, %p8057_p7  ;;  %p7106_p3 = por %p7105_p1, %p7104_p5 }
 0xc12   : > { %p7100_p13 = pneg %p7099_p9 }
 0xc14   : > { %p7107_p4 = pnand %p7106_p3, %p7100_p13 }
 0xc76   : > { %v4972_v61 = vpop.permute.xlu1 %4971 }
 0xc77   : > { %v4978_v62 = vsel %vm4977_vm4, %v4976_v60, %v4972_v61  ;;  %v5474_v61 = vsub.s32 3, %v7533_v57 }
 0xc78   : > { %v4984_v1 = vsel %vm291_vm1, %v4978_v62, 0 }
 0xc79   : > { %v5055_v2 = vand.u32 4294901760, %v4984_v1 }
 0xc7a   : > { %v5485_v10 = vpop.permute.xlu1 %5484 }
 0xc7b   : > { %v5056_v46 = vsub.f32 %v4984_v1, %v5055_v2  ;;  %6764 = vmatmul.mubr.f32.vlgmr.msra.gmra.mxu1 %v5055_v2  ;;  %v7899_v11 = vand.u32 4294901760, %v5485_v10 }
 0xc7c   : > { %6778 = vmatpush3.msra.mxu1 %v7785_v15  ;;  %6785 = vmatprep.mubr.msk.f32.mxu1 %vm7182_vm0, %v7181_v0 }
 0xc7d   : > { %6779 = vmatprep.subr.mxu1 %v7181_v0  ;;  %v5057_v3 = vand.u32 4294901760, %v5056_v46  ;;  %v7902_v14 = vsub.f32 %v5485_v10, %v7899_v11 }
 0xc7e   : > { %6780 = vmatpush3.msra.mxu1 %v7787_v16 }
 0xc7f   : > { %6781 = vmatprep.subr.mxu1 %v7181_v0  ;;  %v5058_v13 = vsub.f32 %v5056_v46, %v5057_v3 }
 0xc80   : > { %6782 = vmatpush3.msra.mxu1 %v7810_v28 }
 0xc81   : > { %6783 = vmatprep.subr.mxu1 %v7181_v0  ;;  %v5059_v4 = vand.u32 4294901760, %v5058_v13 }
 0xc82   : > { %6784 = vmatpush3.msra.mxu1 %v7816_v32 }
 0xc83   : > { %6786 = vmatmul.mubr.f32.vlgmr.msra.gmra.mxu1 %v5057_v3  ;;  %6799 = vmatprep.subr.mxu1 %v7181_v0 }
 0xc84   : > { %6753 = vmatmul.mubr.f32.vlgmr.msra.gmra.mxu0 %v5059_v4  ;;  %6800 = vmatpush3.msra.mxu1 %v7785_v15  ;;  %v7904_v15 = vand.u32 4294901760, %v5483_v12 }
 0xc85   : > { %6767 = vmatpush3.msra.mxu0 %v7791_v17  ;;  %6801 = vmatprep.subr.mxu1 %v7181_v0  ;;  %v5608_v17 = vand.u32 4294901760, %v7902_v14 }
 0xc86   : > { %6768 = vmatprep.subr.mxu0 %v7181_v0  ;;  %6802 = vmatpush3.msra.mxu1 %v7787_v16  ;;  %v5481_v16 = vpop.permute.xlu1 %5480 }
 0xc87   : > { %6769 = vmatpush3.msra.mxu0 %v7794_v18  ;;  %6803 = vmatprep.subr.mxu1 %v7181_v0  ;;  %v7910_v18 = vsub.f32 %v5483_v12, %v7904_v15 }
 0xc88   : > { %6770 = vmatprep.subr.mxu0 %v7181_v0  ;;  %6804 = vmatpush3.msra.mxu1 %v7810_v28 }
 0xc89   : > { %6771 = vmatpush3.msra.mxu0 %v7814_v31  ;;  %6805 = vmatprep.subr.mxu1 %v7181_v0  ;;  %v5615_v22 = vand.u32 4294901760, %v7910_v18 }
 0xc8a   : > { %6772 = vmatprep.subr.mxu0 %v7181_v0  ;;  %6774 = vmatprep.mubr.msk.f32.mxu0 %vm7182_vm0, %v7181_v0 }
 0xc8b   : > { %6773 = vmatpush3.msra.mxu0 %v7822_v35  ;;  %6806 = vmatpush3.msra.mxu1 %v7816_v32  ;;  %v5616_v25 = vsub.f32 %v7910_v18, %v5615_v22 }
 0xc8c   : > { %6807 = vmatprep.mubr.msk.f32.mxu1 %vm7182_vm0, %v7181_v0  ;;  %6775 = vmatmul.mubr.f32.vlgmr.msra.gmra.mxu0 %v5056_v46  ;;  %v5475_v46 = vrot.slane %v7937_v37, %v5474_v61 }
 0xc8d   : > { %6788 = vmatprep.subr.mxu0 %v7181_v0  ;;  %6808 = vmatmul.mubr.f32.vlgmr.msra.gmra.mxu1 %v5055_v2  ;;  %v5617_v28 = vand.u32 4294901760, %v5616_v25 }
 0xc8e   : > { %6789 = vmatpush3.msra.mxu0 %v5092_v19  ;;  %6796 = vmatprep.mubr.msk.f32.mxu0 %vm7182_vm0, %v7181_v0  ;;  %v7912_v19 = vand.u32 4294901760, %v5481_v16 }
 0xc8f   : > { %6790 = vmatprep.subr.mxu0 %v7181_v0  ;;  %6821 = vmatprep.subr.mxu1 %v7181_v0 }
 0xc90   : > { %6791 = vmatpush3.msra.mxu0 %v5099_v21  ;;  %6829 = vmatprep.mubr.msk.f32.mxu1 %vm7182_vm0, %v7181_v0  ;;  %v5609_v21 = vsub.f32 %v7902_v14, %v5608_v17  ;;  %v7922_v23 = vsub.f32 %v5481_v16, %v7912_v19 }
 0xc91   : > { %6792 = vmatprep.subr.mxu0 %v7181_v0  ;;  %6822 = vmatpush3.msra.mxu1 %v5603_v26 }
 0xc92   : > { %6793 = vmatpush3.msra.mxu0 %v5106_v34  ;;  %6823 = vmatprep.subr.mxu1 %v7181_v0  ;;  %v5610_v24 = vand.u32 4294901760, %v5609_v21  ;;  %v5622_v27 = vand.u32 4294901760, %v7922_v23 }
 0xc93   : > { %6794 = vmatprep.subr.mxu0 %v7181_v0 }
 0xc94   : > { %6795 = vmatpush3.msra.mxu0 %v5113_v38  ;;  %v5623_v29 = vsub.f32 %v7922_v23, %v5622_v27  ;;  %6824 = vmatpush3.msra.mxu1 %v5610_v24  ;;  %v4982_v38 = vrot.slane %v7937_v37, %v4981_v33 }
 0xc95   : > { %6797 = vmatmul.mubr.f32.vlgmr.msra.gmra.mxu0 %v5055_v2  ;;  %6810 = vmatprep.subr.mxu0 %v7181_v0 }
 0xc96   : > { %6818 = vmatprep.mubr.msk.f32.mxu0 %vm7182_vm0, %v7181_v0  ;;  %6811 = vmatpush3.msra.mxu0 %v7888_v6  ;;  %v5624_v30 = vand.u32 4294901760, %v5623_v29 }
 0xc97   : > { %6812 = vmatprep.subr.mxu0 %v7181_v0  ;;  %6825 = vmatprep.subr.mxu1 %v7181_v0 }
 0xc98   : > { %6813 = vmatpush3.msra.mxu0 %v7899_v11  ;;  %6826 = vmatpush3.msra.mxu1 %v5617_v28 }
 0xc99   : > { %6814 = vmatprep.subr.mxu0 %v7181_v0  ;;  %6827 = vmatprep.subr.mxu1 %v7181_v0 }
 0xc9a   : > { %6815 = vmatpush3.msra.mxu0 %v7904_v15  ;;  %6828 = vmatpush3.msra.mxu1 %v5624_v30 }
 0xc9b   : > { %6816 = vmatprep.subr.mxu0 %v7181_v0  ;;  %6843 = vmatprep.subr.mxu1 %v7181_v0 }
 0xc9c   : > { %6817 = vmatpush3.msra.mxu0 %v7912_v19 }
 0xc9d   : > { %6832 = vmatprep.subr.mxu0 %v7181_v0 }
 0xd3b   : > { %v5152_v31 = vpop.f32.mrf.mxu1 }
 0xd3d   : > { %v6765_v32 = vpop.f32.mrf.mxu1 }
 0xd3e   : > { %v6007_v32 = vsub.s32 5, %v7533_v57 }
 0xd43   : > { %v5309_v34 = vpop.f32.mrf.mxu1 }
 0xd44   : > { %v5061_v35 = vpop.f32.mrf.mxu0 }
 0xd45   : > { %v6787_v36 = vpop.f32.mrf.mxu1  ;;  %v5062_v40 = vadd.f32 %v5061_v35, %v4982_v38 }
 0xd46   : > { %v6754_v39 = vpop.f32.mrf.mxu0  ;;  %v6008_v36 = vrot.slane %v7937_v37, %v6007_v32 }
 0xd47   : > { %v5153_v43 = vadd.f32 %v5152_v31, %v5062_v40  ;;  %v6002_v31 = vsub.s32 4, %v7533_v57 }
 0xd49   : > { %v6003_v33 = vrot.slane %v7937_v37, %v6002_v31 }
 0xd4c   : > { %v5232_v41 = vpop.f32.mrf.mxu0 }
 0xd4d   : > { %v5467_v42 = vpop.f32.mrf.mxu1  ;;  %v5233_v47 = vadd.f32 %v5232_v41, %v5153_v43 }
 0xd4e   : > { %v6776_v44 = vpop.f32.mrf.mxu0 }
 0xd4f   : > { %v6809_v45 = vpop.f32.mrf.mxu1  ;;  %v5310_v48 = vadd.f32 %v5309_v34, %v5233_v47 }
 0xd55   : > { %v5392_v49 = vpop.f32.mrf.mxu0 }
 0xd56   : > { %v5393_v50 = vadd.f32 %v5392_v49, %v5310_v48 }
 0xd57   : > { %v6798_v51 = vpop.f32.mrf.mxu0 }
 0xd58   : > { %v5468_v52 = vadd.f32 %v5467_v42, %v5393_v50 }
 0xd5a   : > { %v7941_v53 = vadd.f32 %v5468_v52, %v7539_v20 }
 0xd5c   : > { %v5493_v54 = vsel %vm291_vm1, %v7941_v53, 0 }
 0xd5d   : > { %v5564_v63 = vand.u32 4294901760, %v5493_v54 }
 0xd5f   : > { %v5565_v55 = vsub.f32 %v5493_v54, %v5564_v63  ;;  %6830 = vmatmul.mubr.f32.vlgmr.msra.gmra.mxu1 %v5564_v63 }
 0xd60   : > { %6844 = vmatpush3.msra.mxu1 %v7888_v6  ;;  %6851 = vmatprep.mubr.msk.f32.mxu1 %vm7182_vm0, %v7181_v0 }
 0xd61   : > { %6845 = vmatprep.subr.mxu1 %v7181_v0  ;;  %v5566_v56 = vand.u32 4294901760, %v5565_v55 }
 0xd62   : > { %6846 = vmatpush3.msra.mxu1 %v7899_v11 }
 0xd63   : > { %6847 = vmatprep.subr.mxu1 %v7181_v0  ;;  %v5567_v20 = vsub.f32 %v5565_v55, %v5566_v56 }
 0xd64   : > { %6848 = vmatpush3.msra.mxu1 %v7904_v15 }
 0xd65   : > { %6849 = vmatprep.subr.mxu1 %v7181_v0  ;;  %v5568_v58 = vand.u32 4294901760, %v5567_v20 }
 0xd66   : > { %6850 = vmatpush3.msra.mxu1 %v7912_v19 }
 0xd67   : > { %6852 = vmatmul.mubr.f32.vlgmr.msra.gmra.mxu1 %v5566_v56  ;;  %6865 = vmatprep.subr.mxu1 %v7181_v0 }
 0xd68   : > { %6819 = vmatmul.mubr.f32.vlgmr.msra.gmra.mxu0 %v5568_v58  ;;  %6866 = vmatpush3.msra.mxu1 %v7888_v6 }
 0xd69   : > { %6833 = vmatpush3.msra.mxu0 %v7891_v7  ;;  %6867 = vmatprep.subr.mxu1 %v7181_v0 }
 0xd6a   : > { %6834 = vmatprep.subr.mxu0 %v7181_v0  ;;  %6868 = vmatpush3.msra.mxu1 %v7899_v11 }
 0xd6b   : > { %6835 = vmatpush3.msra.mxu0 %v7902_v14  ;;  %6869 = vmatprep.subr.mxu1 %v7181_v0 }
 0xd6c   : > { %6836 = vmatprep.subr.mxu0 %v7181_v0  ;;  %6870 = vmatpush3.msra.mxu1 %v7904_v15 }
 0xd6d   : > { %6837 = vmatpush3.msra.mxu0 %v7910_v18  ;;  %6871 = vmatprep.subr.mxu1 %v7181_v0 }
 0xd6e   : > { %6838 = vmatprep.subr.mxu0 %v7181_v0  ;;  %6840 = vmatprep.mubr.msk.f32.mxu0 %vm7182_vm0, %v7181_v0 }
 0xd6f   : > { %6839 = vmatpush3.msra.mxu0 %v7922_v23  ;;  %6872 = vmatpush3.msra.mxu1 %v7912_v19 }
 0xd70   : > { %6873 = vmatprep.mubr.msk.f32.mxu1 %vm7182_vm0, %v7181_v0  ;;  %6841 = vmatmul.mubr.f32.vlgmr.msra.gmra.mxu0 %v5565_v55 }
 0xd71   : > { %6854 = vmatprep.subr.mxu0 %v7181_v0  ;;  %6874 = vmatmul.mubr.f32.vlgmr.msra.gmra.mxu1 %v5564_v63 }
 0xd72   : > { %6855 = vmatpush3.msra.mxu0 %v5601_v8  ;;  %6862 = vmatprep.mubr.msk.f32.mxu0 %vm7182_vm0, %v7181_v0 }
 0xd73   : > { %6856 = vmatprep.subr.mxu0 %v7181_v0 }
 0xd74   : > { %6857 = vmatpush3.msra.mxu0 %v5608_v17 }
 0xd75   : > { %6858 = vmatprep.subr.mxu0 %v7181_v0 }
 0xd76   : > { %6859 = vmatpush3.msra.mxu0 %v5615_v22 }
 0xd77   : > { %6860 = vmatprep.subr.mxu0 %v7181_v0 }
 0xd78   : > { %6861 = vmatpush3.msra.mxu0 %v5622_v27 }
 0xd79   : > { %6863 = vmatmul.mubr.f32.vlgmr.msra.gmra.mxu0 %v5564_v63 }
 0xe1f   : > { %v5661_v59 = vpop.f32.mrf.mxu1 }
 0xe21   : > { %v6831_v60 = vpop.f32.mrf.mxu1 }
 0xe27   : > { %v5818_v62 = vpop.f32.mrf.mxu1 }
 0xe28   : > { %v5570_v1 = vpop.f32.mrf.mxu0 }
 0xe29   : > { %v6853_v2 = vpop.f32.mrf.mxu1  ;;  %v5571_v13 = vadd.f32 %v5570_v1, %v5475_v46 }
 0xe2a   : > { %v6820_v3 = vpop.f32.mrf.mxu0 }
 0xe2b   : > { %v5662_v6 = vadd.f32 %v5661_v59, %v5571_v13 }
 0xe30   : > { %v5741_v4 = vpop.f32.mrf.mxu0 }
 0xe31   : > { %v5976_v5 = vpop.f32.mrf.mxu1  ;;  %v5742_v8 = vadd.f32 %v5741_v4, %v5662_v6 }
 0xe32   : > { %v6842_v7 = vpop.f32.mrf.mxu0 }
 0xe33   : > { %v6875_v0 = vpop.f32.mrf.mxu1  ;;  %v5819_v9 = vadd.f32 %v5818_v62, %v5742_v8 }
 0xe39   : > { %v5901_v10 = vpop.f32.mrf.mxu0 }
 0xe3a   : > { %v5902_v11 = vadd.f32 %v5901_v10, %v5819_v9 }
 0xe3b   : > { %v6864_v26 = vpop.f32.mrf.mxu0 }
 0xe3c   : > { %v5977_v12 = vadd.f32 %v5976_v5, %v5902_v11 }
 0xe3e   : > { %v5981_v14 = vmul.f32 0.70710677, %v5977_v12  ;;  %v5980_v16 = vmul.f32 0.5, %v5977_v12 }
 0xe40   : > { %6984 = verf.f32 %v5981_v14 }
 0xe4d   : > { %v6985_v15 = vpop.eup %6984 }
 0xe4e   : > { %v5983_v17 = vadd.f32 1.0, %v6985_v15 }
 0xe50   : > { %v5984_v18 = vmul.f32 %v5983_v17, %v5980_v16 }
 0xe52   : > { %v5985_v19 = vadd.f32 %v5984_v18, %v7941_v53 }
 0xe54   : > { %v5986_v21 = vsel %vm291_vm1, %v5985_v19, 0.0 }
 0xe55   : > { %5987 = vadd.xlane.f32.xlu0 %v5986_v21 }
 0xede   : > { %v5988_v22 = vpop.xlane.xlu0 %5987 }
 0xedf   : > { %v5990_v23 = vmul.f32 0.03125, %v5988_v22 }
 0xee1   : > { %v5991_v24 = vsub.f32 %v5985_v19, %v5990_v23 }
 0xee3   : > { %v5992_v25 = vmul.f32 %v5991_v24, %v5991_v24 }
 0xee5   : > { %v5993_v27 = vsel %vm291_vm1, %v5992_v25, 0.0 }
 0xee6   : > { %5994 = vadd.xlane.f32.xlu1 %v5993_v27 }
 0xf6f   : > { %v5995_v28 = vpop.xlane.xlu1 %5994 }
 0xf70   : > { %v5996_v29 = vmul.f32 0.03125, %v5995_v28 }
 0xf72   : > { %v5997_v30 = vadd.f32 1e-05, %v5996_v29 }
 0xf74   : > { %6986 = vrsqrt.f32 %v5997_v30 }
 0xf81   : > { %v6987_v34 = vpop.eup %6986 }
 0xf82   : > { %v5999_v35 = vmul.f32 %v6987_v34, %v5991_v24 }
 0xf84   : > { %v6004_v38 = vmul.f32 %v6003_v33, %v5999_v35 }
 0xf86   : > { %v6009_v39 = vadd.f32 %v6008_v36, %v6004_v38 }
 0xf88   : > { %6010 = vst.msk [vmem:[%s276_s9] sm:$0xff] %vm291_vm1, %v6009_v39 }
 0xf89   : > { %7110 = shalt.err (!%p7107_p4)
}
 0xf8a   : > { %s7111_s2 = scalar_lea.hbm %s6023_s24, 128  ;;  %s7115_s5 = scalar_lea.hbm %s8037_s4, 256 }
 0xf8b   : > { %p7112_p10 = scmp.ne.s32.totalorder %s6023_s24, %s7111_s2  ;;  %p7116_p11 = scmp.lt.s32.totalorder %s6023_s24, %s8037_s4 }
 0xf8c   : > { %p7117_p2 = scmp.lt.s32.totalorder %s7115_s5, %s7111_s2 }
 0xf8d   : > { %p7113_p0 = pnand %p7112_p10, %p8057_p7 }
 0xf8e   : > { %p7118_p6 = por %p7117_p2, %p7116_p11 }
 0xf8f   : > { %p7114_p8 = pneg %p7113_p0 }
 0xf91   : > { %p7119_p12 = pnand %p7118_p6, %p7114_p8 }
 0xf93   : > { %7122 = shalt.err (!%p7119_p12)
}
 0xf94   : > { %6888 = dma.vmem_to_hbm [thread:$0]  (%p8057_p7), %s6026_s21, 128, %s6023_s24, %s6012_s26  }
 0xf95 PF: > { %s6037_s7 = sand.u32 1, %s7161_s15   ;;  %p8058_p9 = scmp.ne.s32.totalorder %s8044_s22, 0 }
 0xf96   : > { %p8059_p13 = scmp.ge.s32.totalorder %s7173_s18, 2  ;;  %s6038_s23 = scalar_lea.sflag [#allocation4], %s6037_s7 }
 0xf98   : > { %p6905_p5 = pnand %p8059_p13, %p8058_p9 }
 0xf9a   : > { %p6906_p1 = pneg %p6905_p5 }
 0xf9c   : > { %7156 = dma.done.wait (%p6906_p1), %s6038_s23, 128  }
 0xf9d   : > { %7158 = vsyncadd (%p6906_p1), %s6038_s23, 4294967168  ;;  %p21_p3 = scmp.ge.s32.totalorder %s7295_s11, 4   ;;  %s8060_s15 = smov %s7165_s16 }
 0xf9e   : > { %s8061_s16 = smov %s7169_s17  ;;  %s8062_s17 = smov %s7311_s20 }
 0xf9f   : > { %s8063_s18 = smov %s7295_s11  ;;  %23 = sbr.rel (!%p21_p3) target bundleno = 10 (0xa), region = 102 }
 0xfa4   :  { %6043 = vsyncpa [#allocation3], 1 }
 0xfa5   :  { %6045 = vsyncpa [#allocation3 + $0x1], 1 }
 0xfa6   :  { %6046 = vsyncpa [#allocation6], 1 }
 0xfa7   :  { %6048 = vsyncpa [#allocation6 + $0x1], 1 }
 0xfa8   :  { %6049 = vsyncpa [#allocation9], 1 }
 0xfa9   :  { %6050 = vsyncpa [#allocation4], 1 }
 0xfaa   :  { %6052 = vsyncpa [#allocation4 + $0x1], 1 }

</bundles_post_ra>
